<compile_context>
chip_gen: v7x
topology: tpu7x:2x2x1
jax: 0.10.0
libtpu: 0.0.40
codegen_flags: <defaults>
</compile_context>

<pallas_src>
import functools

import numpy as np

import jax
import jax.numpy as jnp
from jax.experimental import pallas as pl
from jax.experimental.pallas import tpu as pltpu

PAD_N = 128  # fc3 output padded to a full lane width for a dense store


# ---------------------------------------------------------------------------
# Fused Pallas kernel: one grid step == one image, end-to-end network.
# ---------------------------------------------------------------------------
def _net_kernel(x_ref, c1w_ref, c1b_ref, s1_ref, r1_ref,
                c2w_ref, c2b_ref, s2_ref, r2_ref,
                f1w_ref, f1b_ref, f2w_ref, f2b_ref, f3w_ref, f3b_ref,
                out_ref,
                p1_ref, p2_ref,
                *, kh, ho1, ho2, hp2):
    f32 = jnp.float32

    def conv_relu_pool(src_ref, w_ref, b_ref, s_ref, r_ref, ho, dst_ref):
        # src_ref: (H_in, W_in*Cin); w_ref: (kh, W_in*Cin, Wo*Cout)  (banded weights).
        # Conv = sum over kh row-shifted matmuls (no im2col, input read once).
        acc = jnp.dot(src_ref[0:ho, :], w_ref[0], preferred_element_type=f32)
        for ki in range(1, kh):
            acc = acc + jnp.dot(src_ref[ki:ki + ho, :], w_ref[ki],
                                preferred_element_type=f32)
        acc = acc + b_ref[...]                      # bias, broadcast over rows
        # Fused 2x2/stride-2 max-pool via exact 0/1 selection matmuls:
        #   width (lane-group) pooling, then height (row) pooling; ReLU last
        #   (ReLU commutes with max-pool).
        cp = jnp.maximum(jnp.dot(acc, s_ref[0], preferred_element_type=f32),
                         jnp.dot(acc, s_ref[1], preferred_element_type=f32))
        pooled = jnp.maximum(jnp.dot(r_ref[0], cp, preferred_element_type=f32),
                             jnp.dot(r_ref[1], cp, preferred_element_type=f32))
        dst_ref[...] = jnp.maximum(pooled, 0.0)

    # conv1 + ReLU + pool  -> p1 (VMEM scratch, layout (Hp1, Wp1*C1))
    conv_relu_pool(x_ref, c1w_ref, c1b_ref, s1_ref, r1_ref, ho1, p1_ref)
    # conv2 + ReLU + pool  -> p2 (VMEM scratch, layout (Hp2, Wp2*C2))
    conv_relu_pool(p1_ref, c2w_ref, c2b_ref, s2_ref, r2_ref, ho2, p2_ref)

    # fc1: flatten is folded into the (hp2, Wp2*C2, H1) weight layout -> sum of row dots.
    h1 = jnp.dot(p2_ref[0:1, :], f1w_ref[0], preferred_element_type=f32)
    for h in range(1, hp2):
        h1 = h1 + jnp.dot(p2_ref[h:h + 1, :], f1w_ref[h], preferred_element_type=f32)
    h1 = jnp.maximum(h1 + f1b_ref[...], 0.0)

    # fc2 (ReLU) and fc3 (linear, padded to 128 lanes).
    h2 = jnp.maximum(jnp.dot(h1, f2w_ref[...], preferred_element_type=f32)
                     + f2b_ref[...], 0.0)
    out_ref[...] = (jnp.dot(h2, f3w_ref[...], preferred_element_type=f32)
                    + f3b_ref[...])


# ---------------------------------------------------------------------------
# Parameter init (torch layouts) and one-time preprocessing.
# ---------------------------------------------------------------------------
def init_params(key, num_classes=10, conv_size=(6, 16), kernel_size=5):
    flatten_size = conv_size[1] * kernel_size * kernel_size   # 16*5*5 = 400
    h1 = int(0.6 * flatten_size)                              # 240
    h2 = int(0.36 * flatten_size)                             # 144
    ks = jax.random.split(key, 10)

    def rnd(k, shape, scale):
        return scale * jax.random.normal(k, shape, dtype=jnp.float32)

    return {
        "conv1_w": rnd(ks[0], (conv_size[0], 3, kernel_size, kernel_size), 0.1),
        "conv1_b": rnd(ks[1], (conv_size[0],), 0.1),
        "conv2_w": rnd(ks[2], (conv_size[1], conv_size[0], kernel_size, kernel_size), 0.1),
        "conv2_b": rnd(ks[3], (conv_size[1],), 0.1),
        "fc1_w": rnd(ks[4], (h1, flatten_size), 0.05),   # torch layout (out, in)
        "fc1_b": rnd(ks[5], (h1,), 0.05),
        "fc2_w": rnd(ks[6], (h2, h1), 0.05),
        "fc2_b": rnd(ks[7], (h2,), 0.05),
        "fc3_w": rnd(ks[8], (num_classes, h2), 0.05),
        "fc3_b": rnd(ks[9], (num_classes,), 0.05),
    }


def prepare_params(params, *, num_classes, image_hw=32, conv_size=(6, 16), kernel_size=5):
    """One-time (host-side) weight preprocessing: banded conv weights, tiled biases,
    pooling selection matrices, permuted/transposed fc weights, fc3 padded to 128."""
    ks = kernel_size
    c1, c2 = conv_size
    H = W = image_hw
    ho1, wo1 = H - ks + 1, W - ks + 1
    hp1, wp1 = ho1 // 2, wo1 // 2
    ho2, wo2 = hp1 - ks + 1, wp1 - ks + 1
    hp2, wp2 = ho2 // 2, wo2 // 2
    n_h1 = params["fc1_w"].shape[0]
    n_h2 = params["fc2_w"].shape[0]

    def banded(w, w_in):
        # w: torch (Cout, Cin, kh, kw) -> (kh, W_in*Cin, Wo*Cout) banded matrices
        cout, cin, kh, kw = w.shape
        wo = w_in - kw + 1
        wt = np.transpose(np.asarray(w, np.float32), (2, 3, 1, 0))  # (kh, kw, Cin, Cout)
        big = np.zeros((kh, w_in * cin, wo * cout), np.float32)
        for kj in range(kw):
            for o in range(wo):
                u = o + kj
                big[:, u * cin:(u + 1) * cin, o * cout:(o + 1) * cout] = wt[:, kj]
        return big

    def col_pool_sel(wo, cout):
        # S_j[(2q+j)*C + c, q*C + c] = 1  (horizontal 2x2 pooling selection)
        wp = wo // 2
        s = np.zeros((2, wo * cout, wp * cout), np.float32)
        for j in range(2):
            for q in range(wp):
                s[j, (2 * q + j) * cout + np.arange(cout), q * cout + np.arange(cout)] = 1.0
        return s

    def row_pool_sel(ho):
        # R_i[p, 2p+i] = 1  (vertical 2x2 pooling selection)
        hp = ho // 2
        r = np.zeros((2, hp, ho), np.float32)
        for i in range(2):
            r[i, np.arange(hp), 2 * np.arange(hp) + i] = 1.0
        return r

    # fc1: fold torch's NCHW flatten (c*H*W + h*W + w) into the weight; kernel consumes
    # p2 rows in (h, w*C2 + c) order  ->  weight stored as (hp2, wp2*C2, H1).
    fc1_w = np.asarray(params["fc1_w"], np.float32)
    f1w = fc1_w.reshape(n_h1, c2, hp2, wp2).transpose(2, 3, 1, 0).reshape(hp2, wp2 * c2, n_h1)
    f2w = np.asarray(params["fc2_w"], np.float32).T
    f3w = np.zeros((n_h2, PAD_N), np.float32)
    f3w[:, :num_classes] = np.asarray(params["fc3_w"], np.float32).T
    f3b = np.zeros((1, PAD_N), np.float32)
    f3b[0, :num_classes] = np.asarray(params["fc3_b"], np.float32)

    prepped = {
        "c1w": banded(params["conv1_w"], W),
        "c1b": np.tile(np.asarray(params["conv1_b"], np.float32), wo1)[None, :],
        "s1": col_pool_sel(wo1, c1),
        "r1": row_pool_sel(ho1),
        "c2w": banded(params["conv2_w"], wp1),
        "c2b": np.tile(np.asarray(params["conv2_b"], np.float32), wo2)[None, :],
        "s2": col_pool_sel(wo2, c2),
        "r2": row_pool_sel(ho2),
        "f1w": f1w,
        "f1b": np.asarray(params["fc1_b"], np.float32)[None, :],
        "f2w": f2w,
        "f2b": np.asarray(params["fc2_b"], np.float32)[None, :],
        "f3w": f3w,
        "f3b": f3b,
    }
    return {k: jnp.asarray(v) for k, v in prepped.items()}


# ---------------------------------------------------------------------------
# Forward (single fused pallas_call).
# ---------------------------------------------------------------------------
def forward(prepped, x, *, num_classes, conv_size=(6, 16), kernel_size=5):
    B, cin, H, W = x.shape
    ks = kernel_size
    c1, c2 = conv_size
    ho1, wo1 = H - ks + 1, W - ks + 1
    hp1, wp1 = ho1 // 2, wo1 // 2
    ho2, wo2 = hp1 - ks + 1, wp1 - ks + 1
    hp2, wp2 = ho2 // 2, wo2 // 2

    # Single cheap layout change: NCHW -> (B, H, W*Cin) (free reshape after transpose).
    x2d = jnp.transpose(x, (0, 2, 3, 1)).reshape(B, H, W * cin).astype(jnp.float32)

    w_names = ("c1w", "c1b", "s1", "r1", "c2w", "c2b", "s2", "r2",
               "f1w", "f1b", "f2w", "f2b", "f3w", "f3b")
    w_list = [prepped[k] for k in w_names]

    def resident(arr):
        zeros = (0,) * arr.ndim
        return pl.BlockSpec(arr.shape, lambda b, _z=zeros: _z)   # constant -> no re-DMA

    kernel = functools.partial(_net_kernel, kh=ks, ho1=ho1, ho2=ho2, hp2=hp2)

    out = pl.pallas_call(
        kernel,
        out_shape=jax.ShapeDtypeStruct((B, 1, PAD_N), jnp.float32),
        grid=(B,),
        in_specs=[pl.BlockSpec((None, H, W * cin), lambda b: (b, 0, 0))]
                 + [resident(a) for a in w_list],
        out_specs=pl.BlockSpec((None, 1, PAD_N), lambda b: (b, 0, 0)),
        scratch_shapes=[pltpu.VMEM((hp1, wp1 * c1), jnp.float32),   # pooled conv1 acts
                        pltpu.VMEM((hp2, wp2 * c2), jnp.float32)],  # pooled conv2 acts
        compiler_params=pltpu.CompilerParams(
            dimension_semantics=("parallel",),
            vmem_limit_bytes=32 * 1024 * 1024),
    )(x2d, *w_list)

    return out.reshape(B, PAD_N)[:, :num_classes]


# ---------------------------------------------------------------------------
# Pure-JAX reference (matches the PyTorch module) for a correctness check.
# ---------------------------------------------------------------------------
def reference_forward(params, x):
    dn = ("NCHW", "OIHW", "NCHW")
    hp = jax.lax.Precision.HIGHEST
    y = jax.lax.conv_general_dilated(x, params["conv1_w"], (1, 1), "VALID",
                                     dimension_numbers=dn, precision=hp)
    y = jnp.maximum(y + params["conv1_b"][None, :, None, None], 0.0)
    y = jax.lax.reduce_window(y, -jnp.inf, jax.lax.max, (1, 1, 2, 2), (1, 1, 2, 2), "VALID")
    y = jax.lax.conv_general_dilated(y, params["conv2_w"], (1, 1), "VALID",
                                     dimension_numbers=dn, precision=hp)
    y = jnp.maximum(y + params["conv2_b"][None, :, None, None], 0.0)
    y = jax.lax.reduce_window(y, -jnp.inf, jax.lax.max, (1, 1, 2, 2), (1, 1, 2, 2), "VALID")
    y = y.reshape(x.shape[0], -1)                       # torch.flatten(x, 1) on NCHW
    y = jnp.maximum(jnp.dot(y, params["fc1_w"].T, precision=hp) + params["fc1_b"], 0.0)
    y = jnp.maximum(jnp.dot(y, params["fc2_w"].T, precision=hp) + params["fc2_b"], 0.0)
    return jnp.dot(y, params["fc3_w"].T, precision=hp) + params["fc3_b"]


if __name__ == "__main__":
    key = jax.random.PRNGKey(0)
    k_params, k_x = jax.random.split(key)

    num_classes = 10
    params = init_params(k_params, num_classes=num_classes)
    prepped = prepare_params(params, num_classes=num_classes)

    # Spatial size must be 32x32 so the flatten is 16*5*5 = 400 (as fc1 requires).
    x = jax.random.normal(k_x, (2, 3, 32, 32), dtype=jnp.float32)

    fwd = jax.jit(functools.partial(forward, num_classes=num_classes))
    out = jax.block_until_ready(fwd(prepped, x))
    assert out.shape == (2, num_classes), out.shape

    ref = jax.block_until_ready(reference_forward(params, x))
    np.testing.assert_allclose(np.asarray(out), np.asarray(ref), rtol=2e-2, atol=2e-2)

    print("KERNEL_OK")
</pallas_src>

<mosaic_0001>
module attributes {stable_mosaic.version = 11 : i64} {
  func.func @_net_kernel(%arg0: i32, %arg1: memref<1x32x96xf32, #tpu.memory_space<vmem>>, %arg2: memref<5x96x168xf32, #tpu.memory_space<vmem>>, %arg3: memref<1x168xf32, #tpu.memory_space<vmem>>, %arg4: memref<2x168x84xf32, #tpu.memory_space<vmem>>, %arg5: memref<2x14x28xf32, #tpu.memory_space<vmem>>, %arg6: memref<5x84x160xf32, #tpu.memory_space<vmem>>, %arg7: memref<1x160xf32, #tpu.memory_space<vmem>>, %arg8: memref<2x160x80xf32, #tpu.memory_space<vmem>>, %arg9: memref<2x5x10xf32, #tpu.memory_space<vmem>>, %arg10: memref<5x80x240xf32, #tpu.memory_space<vmem>>, %arg11: memref<1x240xf32, #tpu.memory_space<vmem>>, %arg12: memref<240x144xf32, #tpu.memory_space<vmem>>, %arg13: memref<1x144xf32, #tpu.memory_space<vmem>>, %arg14: memref<144x128xf32, #tpu.memory_space<vmem>>, %arg15: memref<1x128xf32, #tpu.memory_space<vmem>>, %arg16: memref<1x1x128xf32, #tpu.memory_space<vmem>>, %arg17: memref<14x84xf32, #tpu.memory_space<vmem>>, %arg18: memref<5x80xf32, #tpu.memory_space<vmem>>) attributes {dimension_semantics = [#tpu.dimension_semantics<parallel>], iteration_bounds = array<i64: 2>, scalar_prefetch = 0 : i64, scratch_operands = 2 : i64, tpu.core_type = #tpu.core_type<tc>, window_params = [{transform_indices = @transform_0, window_bounds = array<i64: 1, 32, 96>}, {pipeline_mode = #tpu.pipeline_mode<synchronous>, transform_indices = @transform_1, window_bounds = array<i64: 5, 96, 168>}, {pipeline_mode = #tpu.pipeline_mode<synchronous>, transform_indices = @transform_2, window_bounds = array<i64: 1, 168>}, {pipeline_mode = #tpu.pipeline_mode<synchronous>, transform_indices = @transform_3, window_bounds = array<i64: 2, 168, 84>}, {pipeline_mode = #tpu.pipeline_mode<synchronous>, transform_indices = @transform_4, window_bounds = array<i64: 2, 14, 28>}, {pipeline_mode = #tpu.pipeline_mode<synchronous>, transform_indices = @transform_5, window_bounds = array<i64: 5, 84, 160>}, {pipeline_mode = #tpu.pipeline_mode<synchronous>, transform_indices = @transform_6, window_bounds = array<i64: 1, 160>}, {pipeline_mode = #tpu.pipeline_mode<synchronous>, transform_indices = @transform_7, window_bounds = array<i64: 2, 160, 80>}, {pipeline_mode = #tpu.pipeline_mode<synchronous>, transform_indices = @transform_8, window_bounds = array<i64: 2, 5, 10>}, {pipeline_mode = #tpu.pipeline_mode<synchronous>, transform_indices = @transform_9, window_bounds = array<i64: 5, 80, 240>}, {pipeline_mode = #tpu.pipeline_mode<synchronous>, transform_indices = @transform_10, window_bounds = array<i64: 1, 240>}, {pipeline_mode = #tpu.pipeline_mode<synchronous>, transform_indices = @transform_11, window_bounds = array<i64: 240, 144>}, {pipeline_mode = #tpu.pipeline_mode<synchronous>, transform_indices = @transform_12, window_bounds = array<i64: 1, 144>}, {pipeline_mode = #tpu.pipeline_mode<synchronous>, transform_indices = @transform_13, window_bounds = array<i64: 144, 128>}, {pipeline_mode = #tpu.pipeline_mode<synchronous>, transform_indices = @transform_14, window_bounds = array<i64: 1, 128>}, {transform_indices = @transform_15, window_bounds = array<i64: 1, 1, 128>}]} {
    %c0 = arith.constant 0 : index
    %c0_0 = arith.constant 0 : index
    %c0_1 = arith.constant 0 : index
    %0 = vector.load %arg1[%c0, %c0_0, %c0_1] : memref<1x32x96xf32, #tpu.memory_space<vmem>>, vector<1x28x96xf32>
    %1 = vector.shape_cast %0 : vector<1x28x96xf32> to vector<28x96xf32>
    %c0_2 = arith.constant 0 : index
    %c0_3 = arith.constant 0 : index
    %c0_4 = arith.constant 0 : index
    %2 = vector.load %arg2[%c0_2, %c0_3, %c0_4] : memref<5x96x168xf32, #tpu.memory_space<vmem>>, vector<1x96x168xf32>
    %3 = vector.shape_cast %2 : vector<1x96x168xf32> to vector<96x168xf32>
    %cst = arith.constant dense<0.000000e+00> : vector<28x168xf32>
    %4 = tpu.matmul %1, %3, %cst {dimension_numbers = #tpu.dot_dimension_numbers<[1], [0], [0], [1], [0, 0, 1, 1], [], []>} : vector<28x96xf32>, vector<96x168xf32>, vector<28x168xf32> -> vector<28x168xf32>
    %c0_5 = arith.constant 0 : index
    %c1 = arith.constant 1 : index
    %c0_6 = arith.constant 0 : index
    %5 = vector.load %arg1[%c0_5, %c1, %c0_6] : memref<1x32x96xf32, #tpu.memory_space<vmem>>, vector<1x28x96xf32>
    %6 = vector.shape_cast %5 : vector<1x28x96xf32> to vector<28x96xf32>
    %c1_7 = arith.constant 1 : index
    %c0_8 = arith.constant 0 : index
    %c0_9 = arith.constant 0 : index
    %7 = vector.load %arg2[%c1_7, %c0_8, %c0_9] : memref<5x96x168xf32, #tpu.memory_space<vmem>>, vector<1x96x168xf32>
    %8 = vector.shape_cast %7 : vector<1x96x168xf32> to vector<96x168xf32>
    %cst_10 = arith.constant dense<0.000000e+00> : vector<28x168xf32>
    %9 = tpu.matmul %6, %8, %cst_10 {dimension_numbers = #tpu.dot_dimension_numbers<[1], [0], [0], [1], [0, 0, 1, 1], [], []>} : vector<28x96xf32>, vector<96x168xf32>, vector<28x168xf32> -> vector<28x168xf32>
    %10 = arith.addf %4, %9 : vector<28x168xf32>
    %c0_11 = arith.constant 0 : index
    %c2 = arith.constant 2 : index
    %c0_12 = arith.constant 0 : index
    %11 = vector.load %arg1[%c0_11, %c2, %c0_12] : memref<1x32x96xf32, #tpu.memory_space<vmem>>, vector<1x28x96xf32>
    %12 = vector.shape_cast %11 : vector<1x28x96xf32> to vector<28x96xf32>
    %c2_13 = arith.constant 2 : index
    %c0_14 = arith.constant 0 : index
    %c0_15 = arith.constant 0 : index
    %13 = vector.load %arg2[%c2_13, %c0_14, %c0_15] : memref<5x96x168xf32, #tpu.memory_space<vmem>>, vector<1x96x168xf32>
    %14 = vector.shape_cast %13 : vector<1x96x168xf32> to vector<96x168xf32>
    %cst_16 = arith.constant dense<0.000000e+00> : vector<28x168xf32>
    %15 = tpu.matmul %12, %14, %cst_16 {dimension_numbers = #tpu.dot_dimension_numbers<[1], [0], [0], [1], [0, 0, 1, 1], [], []>} : vector<28x96xf32>, vector<96x168xf32>, vector<28x168xf32> -> vector<28x168xf32>
    %16 = arith.addf %10, %15 : vector<28x168xf32>
    %c0_17 = arith.constant 0 : index
    %c3 = arith.constant 3 : index
    %c0_18 = arith.constant 0 : index
    %17 = vector.load %arg1[%c0_17, %c3, %c0_18] : memref<1x32x96xf32, #tpu.memory_space<vmem>>, vector<1x28x96xf32>
    %18 = vector.shape_cast %17 : vector<1x28x96xf32> to vector<28x96xf32>
    %c3_19 = arith.constant 3 : index
    %c0_20 = arith.constant 0 : index
    %c0_21 = arith.constant 0 : index
    %19 = vector.load %arg2[%c3_19, %c0_20, %c0_21] : memref<5x96x168xf32, #tpu.memory_space<vmem>>, vector<1x96x168xf32>
    %20 = vector.shape_cast %19 : vector<1x96x168xf32> to vector<96x168xf32>
    %cst_22 = arith.constant dense<0.000000e+00> : vector<28x168xf32>
    %21 = tpu.matmul %18, %20, %cst_22 {dimension_numbers = #tpu.dot_dimension_numbers<[1], [0], [0], [1], [0, 0, 1, 1], [], []>} : vector<28x96xf32>, vector<96x168xf32>, vector<28x168xf32> -> vector<28x168xf32>
    %22 = arith.addf %16, %21 : vector<28x168xf32>
    %c0_23 = arith.constant 0 : index
    %c4 = arith.constant 4 : index
    %c0_24 = arith.constant 0 : index
    %23 = vector.load %arg1[%c0_23, %c4, %c0_24] : memref<1x32x96xf32, #tpu.memory_space<vmem>>, vector<1x28x96xf32>
    %24 = vector.shape_cast %23 : vector<1x28x96xf32> to vector<28x96xf32>
    %c4_25 = arith.constant 4 : index
    %c0_26 = arith.constant 0 : index
    %c0_27 = arith.constant 0 : index
    %25 = vector.load %arg2[%c4_25, %c0_26, %c0_27] : memref<5x96x168xf32, #tpu.memory_space<vmem>>, vector<1x96x168xf32>
    %26 = vector.shape_cast %25 : vector<1x96x168xf32> to vector<96x168xf32>
    %cst_28 = arith.constant dense<0.000000e+00> : vector<28x168xf32>
    %27 = tpu.matmul %24, %26, %cst_28 {dimension_numbers = #tpu.dot_dimension_numbers<[1], [0], [0], [1], [0, 0, 1, 1], [], []>} : vector<28x96xf32>, vector<96x168xf32>, vector<28x168xf32> -> vector<28x168xf32>
    %28 = arith.addf %22, %27 : vector<28x168xf32>
    %c0_29 = arith.constant 0 : index
    %c0_30 = arith.constant 0 : index
    %29 = vector.load %arg3[%c0_29, %c0_30] : memref<1x168xf32, #tpu.memory_space<vmem>>, vector<1x168xf32>
    %30 = vector.broadcast %29 : vector<1x168xf32> to vector<28x168xf32>
    %31 = arith.addf %28, %30 : vector<28x168xf32>
    %c0_31 = arith.constant 0 : index
    %c0_32 = arith.constant 0 : index
    %c0_33 = arith.constant 0 : index
    %32 = vector.load %arg4[%c0_31, %c0_32, %c0_33] : memref<2x168x84xf32, #tpu.memory_space<vmem>>, vector<1x168x84xf32>
    %33 = vector.shape_cast %32 : vector<1x168x84xf32> to vector<168x84xf32>
    %cst_34 = arith.constant dense<0.000000e+00> : vector<28x84xf32>
    %34 = tpu.matmul %31, %33, %cst_34 {dimension_numbers = #tpu.dot_dimension_numbers<[1], [0], [0], [1], [0, 0, 1, 1], [], []>} : vector<28x168xf32>, vector<168x84xf32>, vector<28x84xf32> -> vector<28x84xf32>
    %c1_35 = arith.constant 1 : index
    %c0_36 = arith.constant 0 : index
    %c0_37 = arith.constant 0 : index
    %35 = vector.load %arg4[%c1_35, %c0_36, %c0_37] : memref<2x168x84xf32, #tpu.memory_space<vmem>>, vector<1x168x84xf32>
    %36 = vector.shape_cast %35 : vector<1x168x84xf32> to vector<168x84xf32>
    %cst_38 = arith.constant dense<0.000000e+00> : vector<28x84xf32>
    %37 = tpu.matmul %31, %36, %cst_38 {dimension_numbers = #tpu.dot_dimension_numbers<[1], [0], [0], [1], [0, 0, 1, 1], [], []>} : vector<28x168xf32>, vector<168x84xf32>, vector<28x84xf32> -> vector<28x84xf32>
    %38 = arith.maximumf %34, %37 : vector<28x84xf32>
    %c0_39 = arith.constant 0 : index
    %c0_40 = arith.constant 0 : index
    %c0_41 = arith.constant 0 : index
    %39 = vector.load %arg5[%c0_39, %c0_40, %c0_41] : memref<2x14x28xf32, #tpu.memory_space<vmem>>, vector<1x14x28xf32>
    %40 = vector.shape_cast %39 : vector<1x14x28xf32> to vector<14x28xf32>
    %cst_42 = arith.constant dense<0.000000e+00> : vector<14x84xf32>
    %41 = tpu.matmul %40, %38, %cst_42 {dimension_numbers = #tpu.dot_dimension_numbers<[1], [0], [0], [1], [0, 0, 1, 1], [], []>} : vector<14x28xf32>, vector<28x84xf32>, vector<14x84xf32> -> vector<14x84xf32>
    %c1_43 = arith.constant 1 : index
    %c0_44 = arith.constant 0 : index
    %c0_45 = arith.constant 0 : index
    %42 = vector.load %arg5[%c1_43, %c0_44, %c0_45] : memref<2x14x28xf32, #tpu.memory_space<vmem>>, vector<1x14x28xf32>
    %43 = vector.shape_cast %42 : vector<1x14x28xf32> to vector<14x28xf32>
    %cst_46 = arith.constant dense<0.000000e+00> : vector<14x84xf32>
    %44 = tpu.matmul %43, %38, %cst_46 {dimension_numbers = #tpu.dot_dimension_numbers<[1], [0], [0], [1], [0, 0, 1, 1], [], []>} : vector<14x28xf32>, vector<28x84xf32>, vector<14x84xf32> -> vector<14x84xf32>
    %45 = arith.maximumf %41, %44 : vector<14x84xf32>
    %cst_47 = arith.constant 0.000000e+00 : f32
    %46 = vector.broadcast %cst_47 : f32 to vector<14x84xf32>
    %47 = arith.maximumf %45, %46 : vector<14x84xf32>
    %c0_48 = arith.constant 0 : index
    %c0_49 = arith.constant 0 : index
    %48 = vector.load %arg17[%c0_48, %c0_49] : memref<14x84xf32, #tpu.memory_space<vmem>>, vector<14x84xf32>
    tpu.vector_store %arg17[%c0_48, %c0_49], %47 {strides = array<i32>} : memref<14x84xf32, #tpu.memory_space<vmem>>, vector<14x84xf32>,
    %c0_50 = arith.constant 0 : index
    %c0_51 = arith.constant 0 : index
    %49 = vector.load %arg17[%c0_50, %c0_51] : memref<14x84xf32, #tpu.memory_space<vmem>>, vector<10x84xf32>
    %c0_52 = arith.constant 0 : index
    %c0_53 = arith.constant 0 : index
    %c0_54 = arith.constant 0 : index
    %50 = vector.load %arg6[%c0_52, %c0_53, %c0_54] : memref<5x84x160xf32, #tpu.memory_space<vmem>>, vector<1x84x160xf32>
    %51 = vector.shape_cast %50 : vector<1x84x160xf32> to vector<84x160xf32>
    %cst_55 = arith.constant dense<0.000000e+00> : vector<10x160xf32>
    %52 = tpu.matmul %49, %51, %cst_55 {dimension_numbers = #tpu.dot_dimension_numbers<[1], [0], [0], [1], [0, 0, 1, 1], [], []>} : vector<10x84xf32>, vector<84x160xf32>, vector<10x160xf32> -> vector<10x160xf32>
    %c1_56 = arith.constant 1 : index
    %c0_57 = arith.constant 0 : index
    %53 = vector.load %arg17[%c1_56, %c0_57] : memref<14x84xf32, #tpu.memory_space<vmem>>, vector<10x84xf32>
    %c1_58 = arith.constant 1 : index
    %c0_59 = arith.constant 0 : index
    %c0_60 = arith.constant 0 : index
    %54 = vector.load %arg6[%c1_58, %c0_59, %c0_60] : memref<5x84x160xf32, #tpu.memory_space<vmem>>, vector<1x84x160xf32>
    %55 = vector.shape_cast %54 : vector<1x84x160xf32> to vector<84x160xf32>
    %cst_61 = arith.constant dense<0.000000e+00> : vector<10x160xf32>
    %56 = tpu.matmul %53, %55, %cst_61 {dimension_numbers = #tpu.dot_dimension_numbers<[1], [0], [0], [1], [0, 0, 1, 1], [], []>} : vector<10x84xf32>, vector<84x160xf32>, vector<10x160xf32> -> vector<10x160xf32>
    %57 = arith.addf %52, %56 : vector<10x160xf32>
    %c2_62 = arith.constant 2 : index
    %c0_63 = arith.constant 0 : index
    %58 = vector.load %arg17[%c2_62, %c0_63] : memref<14x84xf32, #tpu.memory_space<vmem>>, vector<10x84xf32>
    %c2_64 = arith.constant 2 : index
    %c0_65 = arith.constant 0 : index
    %c0_66 = arith.constant 0 : index
    %59 = vector.load %arg6[%c2_64, %c0_65, %c0_66] : memref<5x84x160xf32, #tpu.memory_space<vmem>>, vector<1x84x160xf32>
    %60 = vector.shape_cast %59 : vector<1x84x160xf32> to vector<84x160xf32>
    %cst_67 = arith.constant dense<0.000000e+00> : vector<10x160xf32>
    %61 = tpu.matmul %58, %60, %cst_67 {dimension_numbers = #tpu.dot_dimension_numbers<[1], [0], [0], [1], [0, 0, 1, 1], [], []>} : vector<10x84xf32>, vector<84x160xf32>, vector<10x160xf32> -> vector<10x160xf32>
    %62 = arith.addf %57, %61 : vector<10x160xf32>
    %c3_68 = arith.constant 3 : index
    %c0_69 = arith.constant 0 : index
    %63 = vector.load %arg17[%c3_68, %c0_69] : memref<14x84xf32, #tpu.memory_space<vmem>>, vector<10x84xf32>
    %c3_70 = arith.constant 3 : index
    %c0_71 = arith.constant 0 : index
    %c0_72 = arith.constant 0 : index
    %64 = vector.load %arg6[%c3_70, %c0_71, %c0_72] : memref<5x84x160xf32, #tpu.memory_space<vmem>>, vector<1x84x160xf32>
    %65 = vector.shape_cast %64 : vector<1x84x160xf32> to vector<84x160xf32>
    %cst_73 = arith.constant dense<0.000000e+00> : vector<10x160xf32>
    %66 = tpu.matmul %63, %65, %cst_73 {dimension_numbers = #tpu.dot_dimension_numbers<[1], [0], [0], [1], [0, 0, 1, 1], [], []>} : vector<10x84xf32>, vector<84x160xf32>, vector<10x160xf32> -> vector<10x160xf32>
    %67 = arith.addf %62, %66 : vector<10x160xf32>
    %c4_74 = arith.constant 4 : index
    %c0_75 = arith.constant 0 : index
    %68 = vector.load %arg17[%c4_74, %c0_75] : memref<14x84xf32, #tpu.memory_space<vmem>>, vector<10x84xf32>
    %c4_76 = arith.constant 4 : index
    %c0_77 = arith.constant 0 : index
    %c0_78 = arith.constant 0 : index
    %69 = vector.load %arg6[%c4_76, %c0_77, %c0_78] : memref<5x84x160xf32, #tpu.memory_space<vmem>>, vector<1x84x160xf32>
    %70 = vector.shape_cast %69 : vector<1x84x160xf32> to vector<84x160xf32>
    %cst_79 = arith.constant dense<0.000000e+00> : vector<10x160xf32>
    %71 = tpu.matmul %68, %70, %cst_79 {dimension_numbers = #tpu.dot_dimension_numbers<[1], [0], [0], [1], [0, 0, 1, 1], [], []>} : vector<10x84xf32>, vector<84x160xf32>, vector<10x160xf32> -> vector<10x160xf32>
    %72 = arith.addf %67, %71 : vector<10x160xf32>
    %c0_80 = arith.constant 0 : index
    %c0_81 = arith.constant 0 : index
    %73 = vector.load %arg7[%c0_80, %c0_81] : memref<1x160xf32, #tpu.memory_space<vmem>>, vector<1x160xf32>
    %74 = vector.broadcast %73 : vector<1x160xf32> to vector<10x160xf32>
    %75 = arith.addf %72, %74 : vector<10x160xf32>
    %c0_82 = arith.constant 0 : index
    %c0_83 = arith.constant 0 : index
    %c0_84 = arith.constant 0 : index
    %76 = vector.load %arg8[%c0_82, %c0_83, %c0_84] : memref<2x160x80xf32, #tpu.memory_space<vmem>>, vector<1x160x80xf32>
    %77 = vector.shape_cast %76 : vector<1x160x80xf32> to vector<160x80xf32>
    %cst_85 = arith.constant dense<0.000000e+00> : vector<10x80xf32>
    %78 = tpu.matmul %75, %77, %cst_85 {dimension_numbers = #tpu.dot_dimension_numbers<[1], [0], [0], [1], [0, 0, 1, 1], [], []>} : vector<10x160xf32>, vector<160x80xf32>, vector<10x80xf32> -> vector<10x80xf32>
    %c1_86 = arith.constant 1 : index
    %c0_87 = arith.constant 0 : index
    %c0_88 = arith.constant 0 : index
    %79 = vector.load %arg8[%c1_86, %c0_87, %c0_88] : memref<2x160x80xf32, #tpu.memory_space<vmem>>, vector<1x160x80xf32>
    %80 = vector.shape_cast %79 : vector<1x160x80xf32> to vector<160x80xf32>
    %cst_89 = arith.constant dense<0.000000e+00> : vector<10x80xf32>
    %81 = tpu.matmul %75, %80, %cst_89 {dimension_numbers = #tpu.dot_dimension_numbers<[1], [0], [0], [1], [0, 0, 1, 1], [], []>} : vector<10x160xf32>, vector<160x80xf32>, vector<10x80xf32> -> vector<10x80xf32>
    %82 = arith.maximumf %78, %81 : vector<10x80xf32>
    %c0_90 = arith.constant 0 : index
    %c0_91 = arith.constant 0 : index
    %c0_92 = arith.constant 0 : index
    %83 = vector.load %arg9[%c0_90, %c0_91, %c0_92] : memref<2x5x10xf32, #tpu.memory_space<vmem>>, vector<1x5x10xf32>
    %84 = vector.shape_cast %83 : vector<1x5x10xf32> to vector<5x10xf32>
    %cst_93 = arith.constant dense<0.000000e+00> : vector<5x80xf32>
    %85 = tpu.matmul %84, %82, %cst_93 {dimension_numbers = #tpu.dot_dimension_numbers<[1], [0], [0], [1], [0, 0, 1, 1], [], []>} : vector<5x10xf32>, vector<10x80xf32>, vector<5x80xf32> -> vector<5x80xf32>
    %c1_94 = arith.constant 1 : index
    %c0_95 = arith.constant 0 : index
    %c0_96 = arith.constant 0 : index
    %86 = vector.load %arg9[%c1_94, %c0_95, %c0_96] : memref<2x5x10xf32, #tpu.memory_space<vmem>>, vector<1x5x10xf32>
    %87 = vector.shape_cast %86 : vector<1x5x10xf32> to vector<5x10xf32>
    %cst_97 = arith.constant dense<0.000000e+00> : vector<5x80xf32>
    %88 = tpu.matmul %87, %82, %cst_97 {dimension_numbers = #tpu.dot_dimension_numbers<[1], [0], [0], [1], [0, 0, 1, 1], [], []>} : vector<5x10xf32>, vector<10x80xf32>, vector<5x80xf32> -> vector<5x80xf32>
    %89 = arith.maximumf %85, %88 : vector<5x80xf32>
    %cst_98 = arith.constant 0.000000e+00 : f32
    %90 = vector.broadcast %cst_98 : f32 to vector<5x80xf32>
    %91 = arith.maximumf %89, %90 : vector<5x80xf32>
    %c0_99 = arith.constant 0 : index
    %c0_100 = arith.constant 0 : index
    %92 = vector.load %arg18[%c0_99, %c0_100] : memref<5x80xf32, #tpu.memory_space<vmem>>, vector<5x80xf32>
    tpu.vector_store %arg18[%c0_99, %c0_100], %91 {strides = array<i32>} : memref<5x80xf32, #tpu.memory_space<vmem>>, vector<5x80xf32>,
    %c0_101 = arith.constant 0 : index
    %c0_102 = arith.constant 0 : index
    %93 = vector.load %arg18[%c0_101, %c0_102] : memref<5x80xf32, #tpu.memory_space<vmem>>, vector<1x80xf32>
    %c0_103 = arith.constant 0 : index
    %c0_104 = arith.constant 0 : index
    %c0_105 = arith.constant 0 : index
    %94 = vector.load %arg10[%c0_103, %c0_104, %c0_105] : memref<5x80x240xf32, #tpu.memory_space<vmem>>, vector<1x80x240xf32>
    %95 = vector.shape_cast %94 : vector<1x80x240xf32> to vector<80x240xf32>
    %cst_106 = arith.constant dense<0.000000e+00> : vector<1x240xf32>
    %96 = tpu.matmul %93, %95, %cst_106 {dimension_numbers = #tpu.dot_dimension_numbers<[1], [0], [0], [1], [0, 0, 1, 1], [], []>} : vector<1x80xf32>, vector<80x240xf32>, vector<1x240xf32> -> vector<1x240xf32>
    %c1_107 = arith.constant 1 : index
    %c0_108 = arith.constant 0 : index
    %97 = vector.load %arg18[%c1_107, %c0_108] : memref<5x80xf32, #tpu.memory_space<vmem>>, vector<1x80xf32>
    %c1_109 = arith.constant 1 : index
    %c0_110 = arith.constant 0 : index
    %c0_111 = arith.constant 0 : index
    %98 = vector.load %arg10[%c1_109, %c0_110, %c0_111] : memref<5x80x240xf32, #tpu.memory_space<vmem>>, vector<1x80x240xf32>
    %99 = vector.shape_cast %98 : vector<1x80x240xf32> to vector<80x240xf32>
    %cst_112 = arith.constant dense<0.000000e+00> : vector<1x240xf32>
    %100 = tpu.matmul %97, %99, %cst_112 {dimension_numbers = #tpu.dot_dimension_numbers<[1], [0], [0], [1], [0, 0, 1, 1], [], []>} : vector<1x80xf32>, vector<80x240xf32>, vector<1x240xf32> -> vector<1x240xf32>
    %101 = arith.addf %96, %100 : vector<1x240xf32>
    %c2_113 = arith.constant 2 : index
    %c0_114 = arith.constant 0 : index
    %102 = vector.load %arg18[%c2_113, %c0_114] : memref<5x80xf32, #tpu.memory_space<vmem>>, vector<1x80xf32>
    %c2_115 = arith.constant 2 : index
    %c0_116 = arith.constant 0 : index
    %c0_117 = arith.constant 0 : index
    %103 = vector.load %arg10[%c2_115, %c0_116, %c0_117] : memref<5x80x240xf32, #tpu.memory_space<vmem>>, vector<1x80x240xf32>
    %104 = vector.shape_cast %103 : vector<1x80x240xf32> to vector<80x240xf32>
    %cst_118 = arith.constant dense<0.000000e+00> : vector<1x240xf32>
    %105 = tpu.matmul %102, %104, %cst_118 {dimension_numbers = #tpu.dot_dimension_numbers<[1], [0], [0], [1], [0, 0, 1, 1], [], []>} : vector<1x80xf32>, vector<80x240xf32>, vector<1x240xf32> -> vector<1x240xf32>
    %106 = arith.addf %101, %105 : vector<1x240xf32>
    %c3_119 = arith.constant 3 : index
    %c0_120 = arith.constant 0 : index
    %107 = vector.load %arg18[%c3_119, %c0_120] : memref<5x80xf32, #tpu.memory_space<vmem>>, vector<1x80xf32>
    %c3_121 = arith.constant 3 : index
    %c0_122 = arith.constant 0 : index
    %c0_123 = arith.constant 0 : index
    %108 = vector.load %arg10[%c3_121, %c0_122, %c0_123] : memref<5x80x240xf32, #tpu.memory_space<vmem>>, vector<1x80x240xf32>
    %109 = vector.shape_cast %108 : vector<1x80x240xf32> to vector<80x240xf32>
    %cst_124 = arith.constant dense<0.000000e+00> : vector<1x240xf32>
    %110 = tpu.matmul %107, %109, %cst_124 {dimension_numbers = #tpu.dot_dimension_numbers<[1], [0], [0], [1], [0, 0, 1, 1], [], []>} : vector<1x80xf32>, vector<80x240xf32>, vector<1x240xf32> -> vector<1x240xf32>
    %111 = arith.addf %106, %110 : vector<1x240xf32>
    %c4_125 = arith.constant 4 : index
    %c0_126 = arith.constant 0 : index
    %112 = vector.load %arg18[%c4_125, %c0_126] : memref<5x80xf32, #tpu.memory_space<vmem>>, vector<1x80xf32>
    %c4_127 = arith.constant 4 : index
    %c0_128 = arith.constant 0 : index
    %c0_129 = arith.constant 0 : index
    %113 = vector.load %arg10[%c4_127, %c0_128, %c0_129] : memref<5x80x240xf32, #tpu.memory_space<vmem>>, vector<1x80x240xf32>
    %114 = vector.shape_cast %113 : vector<1x80x240xf32> to vector<80x240xf32>
    %cst_130 = arith.constant dense<0.000000e+00> : vector<1x240xf32>
    %115 = tpu.matmul %112, %114, %cst_130 {dimension_numbers = #tpu.dot_dimension_numbers<[1], [0], [0], [1], [0, 0, 1, 1], [], []>} : vector<1x80xf32>, vector<80x240xf32>, vector<1x240xf32> -> vector<1x240xf32>
    %116 = arith.addf %111, %115 : vector<1x240xf32>
    %c0_131 = arith.constant 0 : index
    %c0_132 = arith.constant 0 : index
    %117 = vector.load %arg11[%c0_131, %c0_132] : memref<1x240xf32, #tpu.memory_space<vmem>>, vector<1x240xf32>
    %118 = arith.addf %116, %117 : vector<1x240xf32>
    %cst_133 = arith.constant 0.000000e+00 : f32
    %119 = vector.broadcast %cst_133 : f32 to vector<1x240xf32>
    %120 = arith.maximumf %118, %119 : vector<1x240xf32>
    %c0_134 = arith.constant 0 : index
    %c0_135 = arith.constant 0 : index
    %121 = vector.load %arg12[%c0_134, %c0_135] : memref<240x144xf32, #tpu.memory_space<vmem>>, vector<240x144xf32>
    %cst_136 = arith.constant dense<0.000000e+00> : vector<1x144xf32>
    %122 = tpu.matmul %120, %121, %cst_136 {dimension_numbers = #tpu.dot_dimension_numbers<[1], [0], [0], [1], [0, 0, 1, 1], [], []>} : vector<1x240xf32>, vector<240x144xf32>, vector<1x144xf32> -> vector<1x144xf32>
    %c0_137 = arith.constant 0 : index
    %c0_138 = arith.constant 0 : index
    %123 = vector.load %arg13[%c0_137, %c0_138] : memref<1x144xf32, #tpu.memory_space<vmem>>, vector<1x144xf32>
    %124 = arith.addf %122, %123 : vector<1x144xf32>
    %cst_139 = arith.constant 0.000000e+00 : f32
    %125 = vector.broadcast %cst_139 : f32 to vector<1x144xf32>
    %126 = arith.maximumf %124, %125 : vector<1x144xf32>
    %c0_140 = arith.constant 0 : index
    %c0_141 = arith.constant 0 : index
    %127 = vector.load %arg14[%c0_140, %c0_141] : memref<144x128xf32, #tpu.memory_space<vmem>>, vector<144x128xf32>
    %cst_142 = arith.constant dense<0.000000e+00> : vector<1x128xf32>
    %128 = tpu.matmul %126, %127, %cst_142 {dimension_numbers = #tpu.dot_dimension_numbers<[1], [0], [0], [1], [0, 0, 1, 1], [], []>} : vector<1x144xf32>, vector<144x128xf32>, vector<1x128xf32> -> vector<1x128xf32>
    %c0_143 = arith.constant 0 : index
    %c0_144 = arith.constant 0 : index
    %129 = vector.load %arg15[%c0_143, %c0_144] : memref<1x128xf32, #tpu.memory_space<vmem>>, vector<1x128xf32>
    %130 = arith.addf %128, %129 : vector<1x128xf32>
    %c0_145 = arith.constant 0 : index
    %c0_146 = arith.constant 0 : index
    %c0_147 = arith.constant 0 : index
    %131 = vector.load %arg16[%c0_145, %c0_146, %c0_147] : memref<1x1x128xf32, #tpu.memory_space<vmem>>, vector<1x1x128xf32>
    %132 = vector.shape_cast %131 : vector<1x1x128xf32> to vector<1x128xf32>
    %133 = vector.shape_cast %130 : vector<1x128xf32> to vector<1x1x128xf32>
    tpu.vector_store %arg16[%c0_145, %c0_146, %c0_147], %133 {strides = array<i32>} : memref<1x1x128xf32, #tpu.memory_space<vmem>>, vector<1x1x128xf32>,
    return
  }
  func.func @transform_0(%arg0: i32) -> (i32, i32, i32) {
    %c0_i32 = arith.constant 0 : i32
    %c0_i32_0 = arith.constant 0 : i32
    %c0_i32_1 = arith.constant 0 : i32
    return %arg0, %c0_i32, %c0_i32_0 : i32, i32, i32
  }
  func.func @transform_1(%arg0: i32) -> (i32, i32, i32) {
    %c0_i32 = arith.constant 0 : i32
    %c0_i32_0 = arith.constant 0 : i32
    %c0_i32_1 = arith.constant 0 : i32
    %c0_i32_2 = arith.constant 0 : i32
    return %c0_i32, %c0_i32_0, %c0_i32_1 : i32, i32, i32
  }
  func.func @transform_2(%arg0: i32) -> (i32, i32) {
    %c0_i32 = arith.constant 0 : i32
    %c0_i32_0 = arith.constant 0 : i32
    %c0_i32_1 = arith.constant 0 : i32
    return %c0_i32, %c0_i32_0 : i32, i32
  }
  func.func @transform_3(%arg0: i32) -> (i32, i32, i32) {
    %c0_i32 = arith.constant 0 : i32
    %c0_i32_0 = arith.constant 0 : i32
    %c0_i32_1 = arith.constant 0 : i32
    %c0_i32_2 = arith.constant 0 : i32
    return %c0_i32, %c0_i32_0, %c0_i32_1 : i32, i32, i32
  }
  func.func @transform_4(%arg0: i32) -> (i32, i32, i32) {
    %c0_i32 = arith.constant 0 : i32
    %c0_i32_0 = arith.constant 0 : i32
    %c0_i32_1 = arith.constant 0 : i32
    %c0_i32_2 = arith.constant 0 : i32
    return %c0_i32, %c0_i32_0, %c0_i32_1 : i32, i32, i32
  }
  func.func @transform_5(%arg0: i32) -> (i32, i32, i32) {
    %c0_i32 = arith.constant 0 : i32
    %c0_i32_0 = arith.constant 0 : i32
    %c0_i32_1 = arith.constant 0 : i32
    %c0_i32_2 = arith.constant 0 : i32
    return %c0_i32, %c0_i32_0, %c0_i32_1 : i32, i32, i32
  }
  func.func @transform_6(%arg0: i32) -> (i32, i32) {
    %c0_i32 = arith.constant 0 : i32
    %c0_i32_0 = arith.constant 0 : i32
    %c0_i32_1 = arith.constant 0 : i32
    return %c0_i32, %c0_i32_0 : i32, i32
  }
  func.func @transform_7(%arg0: i32) -> (i32, i32, i32) {
    %c0_i32 = arith.constant 0 : i32
    %c0_i32_0 = arith.constant 0 : i32
    %c0_i32_1 = arith.constant 0 : i32
    %c0_i32_2 = arith.constant 0 : i32
    return %c0_i32, %c0_i32_0, %c0_i32_1 : i32, i32, i32
  }
  func.func @transform_8(%arg0: i32) -> (i32, i32, i32) {
    %c0_i32 = arith.constant 0 : i32
    %c0_i32_0 = arith.constant 0 : i32
    %c0_i32_1 = arith.constant 0 : i32
    %c0_i32_2 = arith.constant 0 : i32
    return %c0_i32, %c0_i32_0, %c0_i32_1 : i32, i32, i32
  }
  func.func @transform_9(%arg0: i32) -> (i32, i32, i32) {
    %c0_i32 = arith.constant 0 : i32
    %c0_i32_0 = arith.constant 0 : i32
    %c0_i32_1 = arith.constant 0 : i32
    %c0_i32_2 = arith.constant 0 : i32
    return %c0_i32, %c0_i32_0, %c0_i32_1 : i32, i32, i32
  }
  func.func @transform_10(%arg0: i32) -> (i32, i32) {
    %c0_i32 = arith.constant 0 : i32
    %c0_i32_0 = arith.constant 0 : i32
    %c0_i32_1 = arith.constant 0 : i32
    return %c0_i32, %c0_i32_0 : i32, i32
  }
  func.func @transform_11(%arg0: i32) -> (i32, i32) {
    %c0_i32 = arith.constant 0 : i32
    %c0_i32_0 = arith.constant 0 : i32
    %c0_i32_1 = arith.constant 0 : i32
    return %c0_i32, %c0_i32_0 : i32, i32
  }
  func.func @transform_12(%arg0: i32) -> (i32, i32) {
    %c0_i32 = arith.constant 0 : i32
    %c0_i32_0 = arith.constant 0 : i32
    %c0_i32_1 = arith.constant 0 : i32
    return %c0_i32, %c0_i32_0 : i32, i32
  }
  func.func @transform_13(%arg0: i32) -> (i32, i32) {
    %c0_i32 = arith.constant 0 : i32
    %c0_i32_0 = arith.constant 0 : i32
    %c0_i32_1 = arith.constant 0 : i32
    return %c0_i32, %c0_i32_0 : i32, i32
  }
  func.func @transform_14(%arg0: i32) -> (i32, i32) {
    %c0_i32 = arith.constant 0 : i32
    %c0_i32_0 = arith.constant 0 : i32
    %c0_i32_1 = arith.constant 0 : i32
    return %c0_i32, %c0_i32_0 : i32, i32
  }
  func.func @transform_15(%arg0: i32) -> (i32, i32, i32) {
    %c0_i32 = arith.constant 0 : i32
    %c0_i32_0 = arith.constant 0 : i32
    %c0_i32_1 = arith.constant 0 : i32
    return %arg0, %c0_i32, %c0_i32_0 : i32, i32, i32
  }
}

</mosaic_0001>

<bundles_post_ra>
// kernel: forward.1
= control target key start
LH: loop header
LB: loop body
LE: loop exit
PB: predicated region body
PF: predicated region fallthrough
CT: control target
= control target key end

     0   :  { %s6416_s0 = inlined_call_operand.vmem [shape: f32[2,32,96], index: 0, kind: input, shape index: {}]   ;;  %s6417_s1 = inlined_call_operand.vmem [shape: f32[5,96,168], index: 1, kind: input, shape index: {}]   ;;  %s6418_s2 = inlined_call_operand.vmem [shape: f32[1,168], index: 2, kind: input, shape index: {}]   ;;  %s6419_s3 = inlined_call_operand.vmem [shape: f32[2,168,84], index: 3, kind: input, shape index: {}]   ;;  %s6420_s4 = inlined_call_operand.vmem [shape: f32[2,14,28], index: 4, kind: input, shape index: {}]   ;;  %s6421_s5 = inlined_call_operand.vmem [shape: f32[5,84,160], index: 5, kind: input, shape index: {}]   ;;  %s6422_s6 = inlined_call_operand.vmem [shape: f32[1,160], index: 6, kind: input, shape index: {}]   ;;  %s6423_s7 = inlined_call_operand.vmem [shape: f32[2,160,80], index: 7, kind: input, shape index: {}]   ;;  %s6424_s8 = inlined_call_operand.vmem [shape: f32[2,5,10], index: 8, kind: input, shape index: {}]   ;;  %s6425_s9 = inlined_call_operand.vmem [shape: f32[5,80,240], index: 9, kind: input, shape index: {}]   ;;  %s6426_s10 = inlined_call_operand.vmem [shape: f32[1,240], index: 10, kind: input, shape index: {}]   ;;  %s6427_s11 = inlined_call_operand.vmem [shape: f32[240,144], index: 11, kind: input, shape index: {}]   ;;  %s6428_s12 = inlined_call_operand.vmem [shape: f32[1,144], index: 12, kind: input, shape index: {}]   ;;  %s6429_s13 = inlined_call_operand.vmem [shape: f32[144,128], index: 13, kind: input, shape index: {}]   ;;  %s6430_s14 = inlined_call_operand.vmem [shape: f32[1,128], index: 14, kind: input, shape index: {}]   ;;  %s6431_s15 = inlined_call_operand.hbm [shape: f32[2,1,128], index: 15, kind: output, shape index: {}]  }
   0x1   :  { %6438 = sst [smem:[#allocation13_spill]] %s6416_s0 }
   0x2   :  { %20 = vsyncpa [#allocation5], 0 }
   0x3   :  { %22 = vsyncpa [#allocation5 + $0x1], 0  ;;  %s4608_s18 = smov 0   ;;  %s4610_s19 = smov 0  }
   0x4   :  { %s4612_s20 = smov 0   ;;  %s4614_s21 = smov 0  }
   0x5 LB: > { %6439 = sst [smem:[#allocation7_spill]] %s4509_s18  ;;  %s4629_s22 = sadd.s32 4294967295, %s4521_s21   ;;  %s4521_s21 = sphi %s4614_s21, %s6451_s21   ;;  %s4517_s20 = sphi %s4612_s20, %s6453_s20   ;;  %s4513_s19 = sphi %s4610_s19, %s6455_s19   ;;  %s4509_s18 = sphi %s4608_s18, %s6454_s18  }
   0x6   : > { %6440 = sst [smem:[#allocation8_spill]] %s4517_s20  ;;  %s3364_s23 = sadd.s32 4294967294, %s4521_s21  }
   0x7   : > { %6441 = sst [smem:[#allocation9_spill]] %s4521_s21  ;;  %s4633_s24 = sadd.s32 1, %s4521_s21  }
   0x8   : > { %6442 = sst [smem:[#allocation10_spill]] %s4633_s24  ;;  %s355_s25 = sadd.s32 1, %s4517_s20 }
   0x9   : > { %s352_s26 = ssub.s32 %s4521_s21, %s4633_s24  ;;  %p365_p0 = scmp.ne.s32.totalorder %s4517_s20, %s4513_s19 }
   0xa   : > { %p353_p1 = scmp.eq.s32.totalorder %s352_s26, 0  ;;  %p366_p2 = scmp.eq.s32.totalorder %s4629_s22, 1 }
   0xb   : > { %p371_p3 = scmp.ne.s32.totalorder %s4513_s19, %s4509_s18  ;;  %p372_p4 = scmp.eq.s32.totalorder %s3364_s23, 1 }
   0xc   : > { %s4644_s27 = scalar_select %p353_p1, %s4517_s20, %s355_s25  }
   0xd   : > { %p4646_p5 = por %p366_p2, %p365_p0  ;;  %p4650_p6 = por %p372_p4, %p371_p3 }
   0xe   : > { %6443 = sst [smem:[#allocation11_spill]] %s4644_s27  ;;  %p3367_p7 = scmp.ge.s32.totalorder %s4521_s21, 1 }
   0xf   : > { %s6445_s29 = scalar_select %p4650_p6, 1, 0 }
  0x10   : > { %p440_p8 = scmp.lt.s32.totalorder %s4521_s21, 3 }
  0x11   : > { %6446 = sst [smem:[#allocation12_spill]] %s6445_s29 }
  0x12   : > { %p441_p9 = pnand %p3367_p7, %p440_p8 }
  0x13   : > { %v3371_v0 = vld [vmem:[%s6417_s1 + $0xc8] sm:$0xff] (!%p441_p9)  ;;  %v3373_v1 = vld [vmem:[%s6417_s1 + $0xd8] sm:$0xff] (!%p441_p9)  ;;  %v3370_v2 = vld [vmem:[%s6417_s1 + $0xc0] sm:$0xff] (!%p441_p9)  ;;  %v4523_v7 = vmov (!%p441_p9), 0.0   ;;  %v4524_v21 = vmov (!%p441_p9), 0.0|0.0   ;;  %p487_p10 = scmp.lt.s32.totalorder (!%p441_p9), %s4629_s22, 1 }
  0x14   : > { %444 = sbr.rel (%p441_p9) target bundleno = 2404 (0x964), region = 80  ;;  %v3805_v3 = vpack.c.bf16 (!%p441_p9), %v3373_v1, %v3371_v0  ;;  %v3372_v4 = vld [vmem:[%s6417_s1 + $0xd0] sm:$0xff] (!%p441_p9)  ;;  %v3375_v5 = vld [vmem:[%s6417_s1 + $0xe8] sm:$0xff] (!%p441_p9)  ;;  %v3377_v6 = vld [vmem:[%s6417_s1 + $0xf8] sm:$0xff] (!%p441_p9)  ;;  %626 = vmatprep.mubr.f32.mxu0 (!%p441_p9), %v4523_v7  ;;  %3925 = vmatprep.subr.bf16.mxu1 (!%p441_p9), %v4524_v21  ;;  %s6447_s0 = sld [smem:[#allocation13_spill]] (!%p441_p9)  ;;  %vm549_vm0 = vcmask (!%p441_p9), 785408  }
  0x15   : > { %v3807_v8 = vpack.c.bf16 (!%p441_p9), %v3372_v4, %v3370_v2  ;;  %v3809_v9 = vpack.c.bf16 (!%p441_p9), %v3377_v6, %v3375_v5  ;;  %v3374_v10 = vld [vmem:[%s6417_s1 + $0xe0] sm:$0xff] (!%p441_p9)  ;;  %v3376_v11 = vld [vmem:[%s6417_s1 + $0xf0] sm:$0xff] (!%p441_p9)  ;;  %v3379_v12 = vld [vmem:[%s6417_s1 + $0x108] sm:$0xff] (!%p441_p9)  ;;  %vm1207_vm1 = vcmask (!%p441_p9), 326656   ;;  %vm1418_vm2 = vcmask (!%p441_p9), 228352   ;;  %s3747_s16 = sshll.u32 (!%p441_p9), %s4629_s22, 4 }
  0x16   : > { %3806 = vmatprep.subr.bf16.mxu0 (!%p441_p9), %v3805_v3  ;;  %v3381_v13 = vld [vmem:[%s6417_s1 + $0x118] sm:$0xff] (!%p441_p9)  ;;  %v3811_v14 = vpack.c.bf16 (!%p441_p9), %v3376_v11, %v3374_v10  ;;  %v3378_v16 = vld [vmem:[%s6417_s1 + $0x100] sm:$0xff] (!%p441_p9)  ;;  %v3380_v17 = vld [vmem:[%s6417_s1 + $0x110] sm:$0xff] (!%p441_p9)  ;;  %vm1425_vm3 = vcmask (!%p441_p9), 1043456   ;;  %vm4525_vm4 = vmmov (!%p441_p9), 1   ;;  %vm1594_vm6 = vcmask (!%p441_p9), 685056   ;;  %s6374_s24 = scalar_lea.hbm (!%p441_p9), %s6431_s15, %s3747_s16 }
  0x17   : > { %3808 = vmatpush1.bf16.msra.mxu0 (!%p441_p9), %v3807_v8  ;;  %v3813_v15 = vpack.c.bf16 (!%p441_p9), %v3381_v13, %v3379_v12  ;;  %v3383_v18 = vld [vmem:[%s6417_s1 + $0x128] sm:$0xff] (!%p441_p9)  ;;  %v3385_v19 = vld [vmem:[%s6417_s1 + $0x138] sm:$0xff] (!%p441_p9)  ;;  %v3815_v20 = vpack.c.bf16 (!%p441_p9), %v3380_v17, %v3378_v16  ;;  %v3382_v23 = vld [vmem:[%s6417_s1 + $0x120] sm:$0xff] (!%p441_p9)  ;;  %vm1592_vm7 = vcmask (!%p441_p9), 687104   ;;  %vm2213_vm8 = vcmask (!%p441_p9), 261120  }
  0x18   : > { %3810 = vmatprep.subr.bf16.mxu0 (!%p441_p9), %v3809_v9  ;;  %v3817_v22 = vpack.c.bf16 (!%p441_p9), %v3385_v19, %v3383_v18  ;;  %v3384_v24 = vld [vmem:[%s6417_s1 + $0x130] sm:$0xff] (!%p441_p9)  ;;  %v3387_v25 = vld [vmem:[%s6417_s1 + $0x148] sm:$0xff] (!%p441_p9)  ;;  %v3389_v26 = vld [vmem:[%s6417_s1 + $0x158] sm:$0xff] (!%p441_p9)  ;;  %vm4526_vm9 = vmmov (!%p441_p9), 0   ;;  %vm2398_vm10 = vcmask (!%p441_p9), 1041408   ;;  %vm2394_vm12 = vcmask (!%p441_p9), 80896  }
  0x19   : > { %v3819_v27 = vpack.c.bf16 (!%p441_p9), %v3384_v24, %v3382_v23  ;;  %v3821_v28 = vpack.c.bf16 (!%p441_p9), %v3389_v26, %v3387_v25  ;;  %v3386_v29 = vld [vmem:[%s6417_s1 + $0x140] sm:$0xff] (!%p441_p9)  ;;  %v3388_v30 = vld [vmem:[%s6417_s1 + $0x150] sm:$0xff] (!%p441_p9)  ;;  %v3391_v31 = vld [vmem:[%s6417_s1 + $0x168] sm:$0xff] (!%p441_p9)  ;;  %vm2549_vm13 = vcmask (!%p441_p9), 651264   ;;  %vm2594_vm14 = vcmask (!%p441_p9), 654336  }
  0x1a   : > { %v3393_v32 = vld [vmem:[%s6417_s1 + $0x178] sm:$0xff] (!%p441_p9)  ;;  %v3823_v33 = vpack.c.bf16 (!%p441_p9), %v3388_v30, %v3386_v29  ;;  %v3390_v35 = vld [vmem:[%s6417_s1 + $0x160] sm:$0xff] (!%p441_p9)  ;;  %v3392_v36 = vld [vmem:[%s6417_s1 + $0x170] sm:$0xff] (!%p441_p9)  ;;  %vm3125_vm15 = vcmask (!%p441_p9), 916480  }
  0x1b   : > { %3812 = vmatpush1.bf16.msra.mxu0 %v3811_v14  ;;  %s488_s30 = scalar_select %p487_p10, %s4629_s22, 1  ;;  %v3825_v34 = vpack.c.bf16 %v3393_v32, %v3391_v31  ;;  %v497_v37 = vld [vmem:[%s6417_s1 + $0x8] sm:$0xff]  ;;  %v499_v38 = vld [vmem:[%s6417_s1 + $0x18] sm:$0xff]  ;;  %v3827_v39 = vpack.c.bf16 %v3392_v36, %v3390_v35  ;;  %v496_v41 = vld [vmem:[%s6417_s1] sm:$0xff] }
  0x1c   : > { %3814 = vmatprep.subr.bf16.mxu0 %v3813_v15  ;;  %v3829_v40 = vpack.c.bf16 %v499_v38, %v497_v37  ;;  %v498_v42 = vld [vmem:[%s6417_s1 + $0x10] sm:$0xff]  ;;  %v501_v43 = vld [vmem:[%s6417_s1 + $0x28] sm:$0xff]  ;;  %v503_v44 = vld [vmem:[%s6417_s1 + $0x38] sm:$0xff]  ;;  %s4527_s22 = smov [#allocation4]  }
  0x1d   : > { %s3750_s25 = sshll.u32 %s488_s30, 5  ;;  %v3831_v46 = vpack.c.bf16 %v498_v42, %v496_v41  ;;  %v3833_v47 = vpack.c.bf16 %v503_v44, %v501_v43  ;;  %v500_v48 = vld [vmem:[%s6417_s1 + $0x20] sm:$0xff]  ;;  %v502_v49 = vld [vmem:[%s6417_s1 + $0x30] sm:$0xff]  ;;  %v505_v50 = vld [vmem:[%s6417_s1 + $0x48] sm:$0xff]  ;;  %s4463_s29 = sshll.u32 %s4527_s22, 4  ;;  %s4464_s29 = int_to_ptr.vmem [resolvable:$false] %s4463_s29 }
  0x1e   : > { %s4741_s17 = scalar_lea.vmem %s6447_s0, %s3750_s25  ;;  %v507_v51 = vld [vmem:[%s6417_s1 + $0x58] sm:$0xff]  ;;  %v3835_v52 = vpack.c.bf16 %v502_v49, %v500_v48  ;;  %v504_v55 = vld [vmem:[%s6417_s1 + $0x40] sm:$0xff]  ;;  %v506_v56 = vld [vmem:[%s6417_s1 + $0x50] sm:$0xff]  ;;  %s485_s25 = sand.u32 1, %s4513_s19  }
  0x1f   : > { %3816 = vmatpush1.bf16.msra.mxu0 %v3815_v20  ;;  %v520_v45 = vld [vmem:[%s4741_s17 + $0x1] sm:$0xff]  ;;  %v521_v53 = vld [vmem:[%s4741_s17 + $0x9] sm:$0xff]  ;;  %v3837_v54 = vpack.c.bf16 %v507_v51, %v505_v50  ;;  %v511_v58 = vld [vmem:[%s6417_s1 + $0x78] sm:$0xff]  ;;  %v3839_v59 = vpack.c.bf16 %v506_v56, %v504_v55  ;;  %s486_s23 = scalar_lea.vmem [#allocation4], %s485_s25  ;;  %s3297_s18 = scalar_lea.sflag [#allocation5], %s485_s25 }
  0x20   : > { %3818 = vmatprep.subr.bf16.mxu0 %v3817_v22  ;;  %v509_v57 = vld [vmem:[%s6417_s1 + $0x68] sm:$0xff]  ;;  %v522_v60 = vld [vmem:[%s4741_s17 + $0x11] sm:$0xff]  ;;  %v508_v62 = vld [vmem:[%s6417_s1 + $0x60] sm:$0xff]  ;;  %s3309_s20 = sshll.u32 %s486_s23, 4  ;;  %s6376_s20 = int_to_ptr.vmem [resolvable:$true] %s3309_s20 }
  0x21   : > { %v3841_v61 = vpack.c.bf16 %v511_v58, %v509_v57  ;;  %v510_v63 = vld [vmem:[%s6417_s1 + $0x70] sm:$0xff]  ;;  %v513_v0 = vld [vmem:[%s6417_s1 + $0x88] sm:$0xff]  ;;  %v515_v1 = vld [vmem:[%s6417_s1 + $0x98] sm:$0xff]  ;;  %s4459_s30 = scalar_lea.vmem %s6376_s20, 16  ;;  %p4466_p0 = scmp.lt.s32.totalorder %s6376_s20, %s4464_s29 }
  0x22   : > { %v3843_v2 = vpack.c.bf16 %v510_v63, %v508_v62  ;;  %v523_v3 = vld [vmem:[%s4741_s17 + $0x19] sm:$0xf]  ;;  %v3845_v4 = vpack.c.bf16 %v515_v1, %v513_v0  ;;  %v512_v5 = vld [vmem:[%s6417_s1 + $0x80] sm:$0xff]  ;;  %v514_v6 = vld [vmem:[%s6417_s1 + $0x90] sm:$0xff]  ;;  %p4460_p11 = scmp.ne.s32.totalorder %s6376_s20, %s4459_s30 }
  0x23   : > { %3820 = vmatpush1.bf16.msra.mxu0 %v3819_v27  ;;  %v517_v8 = vld [vmem:[%s6417_s1 + $0xa8] sm:$0xff]  ;;  %v519_v9 = vld [vmem:[%s6417_s1 + $0xb8] sm:$0xff]  ;;  %v3847_v10 = vpack.c.bf16 %v514_v6, %v512_v5  ;;  %v516_v12 = vld [vmem:[%s6417_s1 + $0xa0] sm:$0xff] }
  0x24   : > { %3822 = vmatprep.subr.bf16.mxu0 %v3821_v28  ;;  %v3849_v11 = vpack.c.bf16 %v519_v9, %v517_v8  ;;  %v518_v13 = vld [vmem:[%s6417_s1 + $0xb0] sm:$0xff]  ;;  %v3403_v14 = vld [vmem:[%s6417_s1 + $0x188] sm:$0xff]  ;;  %v3405_v15 = vld [vmem:[%s6417_s1 + $0x198] sm:$0xff]  ;;  %p4461_p12 = pnand %p4460_p11, %p4646_p5 }
  0x25   : > { %v3851_v16 = vpack.c.bf16 %v518_v13, %v516_v12  ;;  %v3853_v17 = vpack.c.bf16 %v3405_v15, %v3403_v14  ;;  %v3402_v18 = vld [vmem:[%s6417_s1 + $0x180] sm:$0xff]  ;;  %v3404_v19 = vld [vmem:[%s6417_s1 + $0x190] sm:$0xff]  ;;  %v3407_v20 = vld [vmem:[%s6417_s1 + $0x1a8] sm:$0xff] }
  0x26   : > { %v3409_v22 = vld [vmem:[%s6417_s1 + $0x1b8] sm:$0xff]  ;;  %v1186_v23 = vld [vmem:[%s6419_s3] sm:$0xff]  ;;  %v1187_v24 = vld [vmem:[%s6419_s3 + $0x8] sm:$0xff]  ;;  %v3855_v28 = vpack.c.bf16 %v3404_v19, %v3402_v18  ;;  %p4462_p13 = pneg %p4461_p12 }
  0x27   : > { %3824 = vmatpush1.bf16.msra.mxu0 %v3823_v33  ;;  %v1188_v25 = vld [vmem:[%s6419_s3 + $0x10] sm:$0xff]  ;;  %v1189_v26 = vld [vmem:[%s6419_s3 + $0x18] sm:$0xff]  ;;  %v492_v27 = vld [vmem:[%s4741_s17] sm:$0xff]  ;;  %v3926_v29 = vpack.c.bf16 %v1187_v24, %v1186_v23  ;;  %v3857_v30 = vpack.c.bf16 %v3409_v22, %v3407_v20 }
  0x28   : > { %3826 = vmatprep.subr.bf16.mxu0 %v3825_v34  ;;  %v3406_v31 = vld [vmem:[%s6417_s1 + $0x1a0] sm:$0xff]  ;;  %v3408_v32 = vld [vmem:[%s6417_s1 + $0x1b0] sm:$0xff]  ;;  %v3411_v33 = vld [vmem:[%s6417_s1 + $0x1c8] sm:$0xff]  ;;  %v3929_v35 = vpack.c.bf16 %v1189_v26, %v1188_v25 }
  0x29   : > { %v3413_v34 = vld [vmem:[%s6417_s1 + $0x1d8] sm:$0xff]  ;;  %3927 = vmatpush1.bf16.msra.mxu1 %v3926_v29  ;;  %v1190_v36 = vld [vmem:[%s6419_s3 + $0x20] sm:$0xff]  ;;  %v1191_v37 = vld [vmem:[%s6419_s3 + $0x28] sm:$0xff]  ;;  %v3859_v38 = vpack.c.bf16 %v3408_v32, %v3406_v31 }
  0x2a   : > { %3928 = vmatprep.subr.bf16.mxu1 %v4524_v21  ;;  %v3410_v41 = vld [vmem:[%s6417_s1 + $0x1c0] sm:$0xff]  ;;  %v3412_v42 = vld [vmem:[%s6417_s1 + $0x1d0] sm:$0xff]  ;;  %v3415_v43 = vld [vmem:[%s6417_s1 + $0x1e8] sm:$0xff] }
  0x2b   : > { %3828 = vmatpush1.bf16.msra.mxu0 %v3827_v39  ;;  %v493_v39 = vld [vmem:[%s4741_s17 + $0x8] sm:$0xff]  ;;  %v3417_v44 = vld [vmem:[%s6417_s1 + $0x1f8] sm:$0xff]  ;;  %v3863_v48 = vpack.c.bf16 %v3412_v42, %v3410_v41  ;;  %v494_v49 = vld [vmem:[%s4741_s17 + $0x10] sm:$0xff] }
  0x2c   : > { %3830 = vmatprep.subr.bf16.mxu0 %v3829_v40  ;;  %v3861_v40 = vpack.c.bf16 %v3413_v34, %v3411_v33  ;;  %v3865_v50 = vpack.c.bf16 %v3417_v44, %v3415_v43  ;;  %v3414_v51 = vld [vmem:[%s6417_s1 + $0x1e0] sm:$0xff]  ;;  %v1195_v57 = vld [vmem:[%s6419_s3 + $0x48] sm:$0xff]  ;;  %v3420_v62 = vld [vmem:[%s6417_s1 + $0x210] sm:$0xff] }
  0x2d   : > { %3930 = vmatpush1.bf16.msra.mxu1 %v3929_v35  ;;  %v1194_v56 = vld [vmem:[%s6419_s3 + $0x40] sm:$0xff]  ;;  %v3423_v63 = vld [vmem:[%s6417_s1 + $0x228] sm:$0xff]  ;;  %v3425_v0 = vld [vmem:[%s6417_s1 + $0x238] sm:$0xff] }
  0x2e   : > { %3394 = vmatmul.mubr.msk.f32.vlgmr.msra.gmra.mrb[0].mxu0 %vm549_vm0, %v520_v45  ;;  %v3932_v45 = vpack.c.bf16 %v1191_v37, %v1190_v36  ;;  %3931 = vmatprep.subr.bf16.mxu1 %v4524_v21  ;;  %v3938_v1 = vpack.c.bf16 %v1195_v57, %v1194_v56  ;;  %v3873_v5 = vpack.c.bf16 %v3425_v0, %v3423_v63  ;;  %v3422_v6 = vld [vmem:[%s6417_s1 + $0x220] sm:$0xff]  ;;  %v3424_v8 = vld [vmem:[%s6417_s1 + $0x230] sm:$0xff]  ;;  %v3431_v9 = vld [vmem:[%s6417_s1 + $0x248] sm:$0xff] }
  0x2f   : > { %3832 = vmatpush1.bf16.msra.mxu0 %v3831_v46  ;;  %632 = vmatprep.mubr.f32.mxu0 %v4523_v7  ;;  %v1192_v46 = vld [vmem:[%s6419_s3 + $0x30] sm:$0xff]  ;;  %v1198_v12 = vld [vmem:[%s6419_s3 + $0x60] sm:$0xff]  ;;  %v1199_v13 = vld [vmem:[%s6419_s3 + $0x68] sm:$0xff]  ;;  %v3875_v14 = vpack.c.bf16 %v3424_v8, %v3422_v6 }
  0x30   : > { %3834 = vmatprep.subr.bf16.mxu0 %v3833_v47  ;;  %v1193_v47 = vld [vmem:[%s6419_s3 + $0x38] sm:$0xff]  ;;  %v3435_v18 = vld [vmem:[%s6417_s1 + $0x268] sm:$0xff]  ;;  %v3944_v20 = vpack.c.bf16 %v1199_v13, %v1198_v12  ;;  %v1200_v22 = vld [vmem:[%s6419_s3 + $0x70] sm:$0xff] }
  0x31   : > { %3933 = vmatpush1.bf16.msra.mxu1 %v3932_v45  ;;  %v3935_v55 = vpack.c.bf16 %v1193_v47, %v1192_v46  ;;  %v3437_v19 = vld [vmem:[%s6417_s1 + $0x278] sm:$0xff]  ;;  %v752_v24 = vld [vmem:[%s4741_s17 + $0x2] sm:$0xff]  ;;  %v753_v35 = vld [vmem:[%s4741_s17 + $0xa] sm:$0xff] }
  0x32   : > { %3395 = vmatmul.mubr.msk.f32.gmra.mrb[2].mxu0 %vm549_vm0, %v521_v53  ;;  %v3419_v53 = vld [vmem:[%s6417_s1 + $0x208] sm:$0xff]  ;;  %3934 = vmatprep.subr.bf16.mxu1 %v4524_v21  ;;  %v1201_v23 = vld [vmem:[%s6419_s3 + $0x78] sm:$0xff]  ;;  %v3881_v26 = vpack.c.bf16 %v3437_v19, %v3435_v18  ;;  %v1202_v32 = vld [vmem:[%s6419_s3 + $0x80] sm:$0xff] }
  0x33   : > { %3836 = vmatpush1.bf16.msra.mxu0 %v3835_v52  ;;  %638 = vmatprep.mubr.f32.mxu0 %v4523_v7  ;;  %v3416_v52 = vld [vmem:[%s6417_s1 + $0x1f0] sm:$0xff]  ;;  %v3439_v29 = vld [vmem:[%s6417_s1 + $0x288] sm:$0xff]  ;;  %v3947_v31 = vpack.c.bf16 %v1201_v23, %v1200_v22  ;;  %v3438_v37 = vld [vmem:[%s6417_s1 + $0x280] sm:$0xff] }
  0x34   : > { %3838 = vmatprep.subr.bf16.mxu0 %v3837_v54  ;;  %v3421_v54 = vld [vmem:[%s6417_s1 + $0x218] sm:$0xff]  ;;  %v3867_v58 = vpack.c.bf16 %v3416_v52, %v3414_v51  ;;  %v1203_v33 = vld [vmem:[%s6419_s3 + $0x88] sm:$0xff]  ;;  %v1204_v42 = vld [vmem:[%s6419_s3 + $0x90] sm:$0xff] }
  0x35   : > { %3936 = vmatpush1.bf16.msra.mxu1 %v3935_v55  ;;  %v3950_v41 = vpack.c.bf16 %v1203_v33, %v1202_v32  ;;  %v1205_v43 = vld [vmem:[%s6419_s3 + $0x98] sm:$0xff]  ;;  %v3442_v47 = vld [vmem:[%s6417_s1 + $0x2a0] sm:$0xff]  ;;  %v3448_v56 = vld [vmem:[%s6417_s1 + $0x2d0] sm:$0xff] }
  0x36   : > { %3396 = vmatmul.mubr.msk.f32.gmra.mrb[4].mxu0 %vm549_vm0, %v522_v60  ;;  %v3869_v60 = vpack.c.bf16 %v3421_v54, %v3419_v53  ;;  %3937 = vmatprep.subr.bf16.mxu1 %v4524_v21  ;;  %v754_v45 = vld [vmem:[%s4741_s17 + $0x12] sm:$0xff]  ;;  %v3953_v51 = vpack.c.bf16 %v1205_v43, %v1204_v42  ;;  %v755_v53 = vld [vmem:[%s4741_s17 + $0x1a] sm:$0xf]  ;;  %v3446_v55 = vld [vmem:[%s6417_s1 + $0x2c0] sm:$0xff] }
  0x37   : > { %3840 = vmatpush1.bf16.msra.mxu0 %v3839_v59  ;;  %644 = vmatprep.mubr.f32.mxu0 %v4523_v7  ;;  %v495_v59 = vld [vmem:[%s4741_s17 + $0x18] sm:$0xf]  ;;  %v3451_v57 = vld [vmem:[%s6417_s1 + $0x2e8] sm:$0xff]  ;;  %v3464_v12 = vld [vmem:[%s6417_s1 + $0x330] sm:$0xff] }
  0x38   : > { %3842 = vmatprep.subr.bf16.mxu0 %v3841_v61  ;;  %v3418_v61 = vld [vmem:[%s6417_s1 + $0x200] sm:$0xff]  ;;  %v3459_v63 = vld [vmem:[%s6417_s1 + $0x308] sm:$0xff]  ;;  %v3461_v0 = vld [vmem:[%s6417_s1 + $0x318] sm:$0xff] }
  0x39   : > { %3939 = vmatpush1.bf16.msra.mxu1 %v3938_v1  ;;  %v3465_v6 = vld [vmem:[%s6417_s1 + $0x338] sm:$0xff]  ;;  %v890_v8 = vld [vmem:[%s4741_s17 + $0x3] sm:$0xff]  ;;  %v3468_v19 = vld [vmem:[%s6417_s1 + $0x350] sm:$0xff] }
  0x3a   : > { %3397 = vmatmul.mubr.msk.f32.gmra.mrb[6].mxu0 %vm549_vm0, %v523_v3  ;;  %v1197_v3 = vld [vmem:[%s6419_s3 + $0x58] sm:$0xff]  ;;  %3940 = vmatprep.subr.bf16.mxu1 %v4524_v21  ;;  %v3467_v13 = vld [vmem:[%s6417_s1 + $0x348] sm:$0xff]  ;;  %v3466_v18 = vld [vmem:[%s6417_s1 + $0x340] sm:$0xff] }
  0x3b   : > { %3844 = vmatpush1.bf16.msra.mxu0 %v3843_v2  ;;  %727 = vmatprep.mubr.f32.mxu0 %v4523_v7  ;;  %v1196_v2 = vld [vmem:[%s6419_s3 + $0x50] sm:$0xff]  ;;  %v3473_v22 = vld [vmem:[%s6417_s1 + $0x378] sm:$0xff]  ;;  %v3911_v23 = vpack.c.bf16 %v3468_v19, %v3466_v18  ;;  %v3474_v33 = vld [vmem:[%s6417_s1 + $0x380] sm:$0xff] }
  0x3c   : > { %3846 = vmatprep.subr.bf16.mxu0 %v3845_v4  ;;  %v3871_v4 = vpack.c.bf16 %v3420_v62, %v3418_v61  ;;  %v3450_v61 = vld [vmem:[%s6417_s1 + $0x2e0] sm:$0xff]  ;;  %v3452_v62 = vld [vmem:[%s6417_s1 + $0x2f0] sm:$0xff]  ;;  %v3498_v19 = vld [vmem:[%s6419_s3 + $0xe8] sm:$0xff] }
  0x3d   : > { %v3899_v1 = vpack.c.bf16 %v3452_v62, %v3450_v61  ;;  %v1028_v42 = vld [vmem:[%s4741_s17 + $0x4] sm:$0xff]  ;;  %v1029_v43 = vld [vmem:[%s4741_s17 + $0xc] sm:$0xff]  ;;  %v3492_v61 = vld [vmem:[%s6419_s3 + $0xb8] sm:$0xff] }
  0x3e   : > { %v3493_v62 = vld [vmem:[%s6419_s3 + $0xc0] sm:$0xff]  ;;  %vm3990_vm5 = vmpackc.low %vm1425_vm3, %vm4525_vm4 }
  0x3f   : > { %3848 = vmatpush1.bf16.msra.mxu0 %v3847_v10  ;;  %v3433_v10 = vld [vmem:[%s6417_s1 + $0x258] sm:$0xff]  ;;  %vm4167_vm11 = vmpackc.low %vm2398_vm10, %vm4525_vm4 }
  0x40   : > { %3850 = vmatprep.subr.bf16.mxu0 %v3849_v11  ;;  %v3941_v11 = vpack.c.bf16 %v1197_v3, %v1196_v2  ;;  %v3877_v15 = vpack.c.bf16 %v3433_v10, %v3431_v9  ;;  %v3901_v2 = vpack.c.bf16 %v3461_v0, %v3459_v63  ;;  %v3458_v3 = vld [vmem:[%s6417_s1 + $0x300] sm:$0xff] }
  0x42   : > { %3942 = vmatpush1.bf16.msra.mxu1 %v3941_v11  ;;  %v3462_v11 = vld [vmem:[%s6417_s1 + $0x320] sm:$0xff] }
  0x43   : > { %3852 = vmatpush1.bf16.msra.mxu0 %v3851_v16  ;;  %v3430_v16 = vld [vmem:[%s6417_s1 + $0x240] sm:$0xff]  ;;  %3943 = vmatprep.subr.bf16.mxu1 %v4524_v21 }
  0x44   : > { %3854 = vmatprep.subr.bf16.mxu0 %v3853_v17  ;;  %v3432_v17 = vld [vmem:[%s6417_s1 + $0x250] sm:$0xff] }
  0x45   : > { %v3879_v25 = vpack.c.bf16 %v3432_v17, %v3430_v16  ;;  %v891_v16 = vld [vmem:[%s4741_s17 + $0xb] sm:$0xff] }
  0x46   : > { %3398 = vmatmul.mubr.msk.f32.vlgmr.msra.gmra.mrb[0].mxu0 %vm549_vm0, %v492_v27  ;;  %v3434_v27 = vld [vmem:[%s6417_s1 + $0x260] sm:$0xff]  ;;  %3945 = vmatpush1.bf16.msra.mxu1 %v3944_v20  ;;  %v3471_v20 = vld [vmem:[%s6417_s1 + $0x368] sm:$0xff] }
  0x47   : > { %3856 = vmatpush1.bf16.msra.mxu0 %v3855_v28  ;;  %733 = vmatprep.mubr.f32.mxu0 %v4523_v7  ;;  %v3436_v28 = vld [vmem:[%s6417_s1 + $0x270] sm:$0xff] }
  0x48   : > { %3858 = vmatprep.subr.bf16.mxu0 %v3857_v30  ;;  %v3441_v30 = vld [vmem:[%s6417_s1 + $0x298] sm:$0xff]  ;;  %3946 = vmatprep.subr.bf16.mxu1 %v4524_v21  ;;  %v3883_v34 = vpack.c.bf16 %v3436_v28, %v3434_v27  ;;  %v3472_v27 = vld [vmem:[%s6417_s1 + $0x370] sm:$0xff]  ;;  %v3475_v28 = vld [vmem:[%s6417_s1 + $0x388] sm:$0xff] }
  0x49   : > { %v3885_v36 = vpack.c.bf16 %v3441_v30, %v3439_v29  ;;  %v3477_v29 = vld [vmem:[%s6417_s1 + $0x398] sm:$0xff] }
  0x4a   : > { %3399 = vmatmul.mubr.msk.f32.gmra.mrb[2].mxu0 %vm549_vm0, %v493_v39  ;;  %v3443_v39 = vld [vmem:[%s6417_s1 + $0x2a8] sm:$0xff]  ;;  %3948 = vmatpush1.bf16.msra.mxu1 %v3947_v31  ;;  %v893_v31 = vld [vmem:[%s4741_s17 + $0x1b] sm:$0xf]  ;;  %v3917_v32 = vpack.c.bf16 %v3477_v29, %v3475_v28 }
  0x4b   : > { %3860 = vmatpush1.bf16.msra.mxu0 %v3859_v38  ;;  %739 = vmatprep.mubr.f32.mxu0 %v4523_v7  ;;  %v3440_v38 = vld [vmem:[%s6417_s1 + $0x290] sm:$0xff]  ;;  %v3504_v29 = vld [vmem:[%s6419_s3 + $0x118] sm:$0xff] }
  0x4c   : > { %3862 = vmatprep.subr.bf16.mxu0 %v3861_v40  ;;  %v3445_v40 = vld [vmem:[%s6417_s1 + $0x2b8] sm:$0xff]  ;;  %3949 = vmatprep.subr.bf16.mxu1 %v4524_v21  ;;  %v3887_v44 = vpack.c.bf16 %v3440_v38, %v3438_v37 }
  0x4d   : > { %v3889_v46 = vpack.c.bf16 %v3445_v40, %v3443_v39  ;;  %v3478_v39 = vld [vmem:[%s6417_s1 + $0x3a0] sm:$0xff]  ;;  %v3480_v40 = vld [vmem:[%s6417_s1 + $0x3b0] sm:$0xff] }
  0x4e   : > { %3400 = vmatmul.mubr.msk.f32.gmra.mrb[4].mxu0 %vm549_vm0, %v494_v49  ;;  %v3447_v49 = vld [vmem:[%s6417_s1 + $0x2c8] sm:$0xff]  ;;  %3951 = vmatpush1.bf16.msra.mxu1 %v3950_v41  ;;  %v3923_v41 = vpack.c.bf16 %v3480_v40, %v3478_v39  ;;  %v1416_v39 = vld [vmem:[%s6420_s4] sm:$0xff] }
  0x4f   : > { %3864 = vmatpush1.bf16.msra.mxu0 %v3863_v48  ;;  %745 = vmatprep.mubr.f32.mxu0 %v4523_v7  ;;  %v3444_v48 = vld [vmem:[%s6417_s1 + $0x2b0] sm:$0xff] }
  0x50   : > { %3866 = vmatprep.subr.bf16.mxu0 %v3865_v50  ;;  %v3449_v50 = vld [vmem:[%s6417_s1 + $0x2d8] sm:$0xff]  ;;  %3952 = vmatprep.subr.bf16.mxu1 %v4524_v21  ;;  %v3891_v52 = vpack.c.bf16 %v3444_v48, %v3442_v47  ;;  %v1168_v47 = vlaneseq }
  0x51   : > { %v3893_v54 = vpack.c.bf16 %v3449_v50, %v3447_v49  ;;  %v1166_v50 = vld [vmem:[%s6418_s2] sm:$0x3] }
  0x52   : > { %3401 = vmatmul.mubr.msk.f32.gmra.mrb[6].mxu0 %vm549_vm0, %v495_v59  ;;  %3954 = vmatpush1.bf16.msra.mxu1 %v3953_v51  ;;  %v3895_v59 = vpack.c.bf16 %v3448_v56, %v3446_v55  ;;  %v1169_v48 = vshrl.u32 %v1168_v47, 7  ;;  %v3491_v55 = vld [vmem:[%s6419_s3 + $0xb0] sm:$0xff] }
  0x53   : > { %3868 = vmatpush1.bf16.msra.mxu0 %v3867_v58  ;;  %857 = vmatprep.mubr.f32.mxu0 %v4523_v7  ;;  %v3453_v58 = vld [vmem:[%s6417_s1 + $0x2f8] sm:$0xff] }
  0x54   : > { %3870 = vmatprep.subr.bf16.mxu0 %v3869_v60  ;;  %1260 = vmatprep.subr.mxu1 %v4523_v7  ;;  %v3897_v60 = vpack.c.bf16 %v3453_v58, %v3451_v57  ;;  %v5159_v49 = vsub.s32 1, %v1169_v48  ;;  %v5164_v51 = vsub.s32 0, %v1169_v48 }
  0x57   : > { %3872 = vmatpush1.bf16.msra.mxu0 %v3871_v4  ;;  %v3460_v4 = vld [vmem:[%s6417_s1 + $0x310] sm:$0xff] }
  0x58   : > { %3874 = vmatprep.subr.bf16.mxu0 %v3873_v5  ;;  %v3463_v5 = vld [vmem:[%s6417_s1 + $0x328] sm:$0xff]  ;;  %v3903_v9 = vpack.c.bf16 %v3460_v4, %v3458_v3 }
  0x59   : > { %v3905_v10 = vpack.c.bf16 %v3465_v6, %v3463_v5  ;;  %v3494_v4 = vld [vmem:[%s6419_s3 + $0xc8] sm:$0xff]  ;;  %v3495_v5 = vld [vmem:[%s6419_s3 + $0xd0] sm:$0xff] }
  0x5b   : > { %3876 = vmatpush1.bf16.msra.mxu0 %v3875_v14  ;;  %v3469_v14 = vld [vmem:[%s6417_s1 + $0x358] sm:$0xff] }
  0x5c   : > { %3878 = vmatprep.subr.bf16.mxu0 %v3877_v15  ;;  %v3907_v15 = vpack.c.bf16 %v3464_v12, %v3462_v11  ;;  %v3909_v17 = vpack.c.bf16 %v3469_v14, %v3467_v13  ;;  %v3496_v12 = vld [vmem:[%s6419_s3 + $0xd8] sm:$0xff]  ;;  %v3497_v13 = vld [vmem:[%s6419_s3 + $0xe0] sm:$0xff] }
  0x5e   : > { %3426 = vmatmul.mubr.msk.f32.vlgmr.msra.gmra.mrb[0].mxu0 %vm549_vm0, %v752_v24  ;;  %v892_v24 = vld [vmem:[%s4741_s17 + $0x13] sm:$0xff] }
  0x5f   : > { %3880 = vmatpush1.bf16.msra.mxu0 %v3879_v25  ;;  %863 = vmatprep.mubr.f32.mxu0 %v4523_v7  ;;  %v3913_v25 = vpack.c.bf16 %v3473_v22, %v3471_v20  ;;  %v3499_v20 = vld [vmem:[%s6419_s3 + $0xf0] sm:$0xff] }
  0x60   : > { %3882 = vmatprep.subr.bf16.mxu0 %v3881_v26  ;;  %v3470_v26 = vld [vmem:[%s6417_s1 + $0x360] sm:$0xff]  ;;  %v3968_v22 = vpack.c.bf16 %v3499_v20, %v3498_v19  ;;  %v3531_v19 = vld [vmem:[%s6421_s5 + $0xf0] sm:$0xff] }
  0x61   : > { %v3915_v30 = vpack.c.bf16 %v3472_v27, %v3470_v26  ;;  %v3502_v26 = vld [vmem:[%s6419_s3 + $0x108] sm:$0xff]  ;;  %v3503_v27 = vld [vmem:[%s6419_s3 + $0x110] sm:$0xff]  ;;  %v3533_v20 = vld [vmem:[%s6421_s5 + $0x100] sm:$0xff] }
  0x62   : > { %3427 = vmatmul.mubr.msk.f32.gmra.mrb[2].mxu0 %vm549_vm0, %v753_v35  ;;  %v3479_v35 = vld [vmem:[%s6417_s1 + $0x3a8] sm:$0xff]  ;;  %v3974_v28 = vpack.c.bf16 %v3503_v27, %v3502_v26  ;;  %v3535_v26 = vld [vmem:[%s6421_s5 + $0x110] sm:$0xff]  ;;  %v3537_v27 = vld [vmem:[%s6421_s5 + $0x120] sm:$0xff] }
  0x63   : > { %3884 = vmatpush1.bf16.msra.mxu0 %v3883_v34  ;;  %869 = vmatprep.mubr.f32.mxu0 %v4523_v7  ;;  %v3476_v34 = vld [vmem:[%s6417_s1 + $0x390] sm:$0xff] }
  0x64   : > { %3886 = vmatprep.subr.bf16.mxu0 %v3885_v36  ;;  %v3481_v36 = vld [vmem:[%s6417_s1 + $0x3b8] sm:$0xff]  ;;  %v3919_v37 = vpack.c.bf16 %v3476_v34, %v3474_v33  ;;  %v3507_v33 = vld [vmem:[%s6419_s3 + $0x130] sm:$0xff] }
  0x65   : > { %v3921_v38 = vpack.c.bf16 %v3481_v36, %v3479_v35  ;;  %v3508_v35 = vld [vmem:[%s6419_s3 + $0x138] sm:$0xff]  ;;  %v3509_v36 = vld [vmem:[%s6419_s3 + $0x140] sm:$0xff] }
  0x66   : > { %3428 = vmatmul.mubr.msk.f32.gmra.mrb[4].mxu0 %vm549_vm0, %v754_v45  ;;  %v1031_v45 = vld [vmem:[%s4741_s17 + $0x1c] sm:$0xf] }
  0x67   : > { %3888 = vmatpush1.bf16.msra.mxu0 %v3887_v44  ;;  %875 = vmatprep.mubr.f32.mxu0 %v4523_v7  ;;  %v1030_v44 = vld [vmem:[%s4741_s17 + $0x14] sm:$0xff]  ;;  %s4465_s17 = scalar_lea.vmem %s4464_s29, 32 }
  0x68   : > { %3890 = vmatprep.subr.bf16.mxu0 %v3889_v46  ;;  %v1206_v46 = vld [vmem:[%s6419_s3 + $0xa0] sm:$0xff]  ;;  %p4467_p1 = scmp.lt.s32.totalorder %s4465_s17, %s4459_s30 }
  0x69   : > { %1261 = vmatpush1.msra.mxu1 %v1206_v46 }
  0x6a   : > { %3429 = vmatmul.mubr.msk.f32.gmra.mrb[6].mxu0 %vm549_vm0, %v755_v53  ;;  %3955 = vmatprep.subr.bf16.mxu1 %v4524_v21  ;;  %v1171_v53 = vrot.slane %v1166_v50, %v5164_v51  ;;  %p4468_p2 = por %p4467_p1, %p4466_p0 }
  0x6b   : > { %3892 = vmatpush1.bf16.msra.mxu0 %v3891_v52  ;;  %995 = vmatprep.mubr.f32.mxu0 %v4523_v7  ;;  %v1175_v52 = vrot.slane %v1166_v50, %v5159_v49 }
  0x6c   : > { %3894 = vmatprep.subr.bf16.mxu0 %v3893_v54  ;;  %v3490_v54 = vld [vmem:[%s6419_s3 + $0xa8] sm:$0xff]  ;;  %p4469_p3 = pnand %p4468_p2, %p4462_p13 }
  0x6f   : > { %3896 = vmatpush1.bf16.msra.mxu0 %v3895_v59  ;;  %v3956_v59 = vpack.c.bf16 %v3491_v55, %v3490_v54 }
  0x70   : > { %3898 = vmatprep.subr.bf16.mxu0 %v3897_v60 }
  0x73   : > { %3900 = vmatpush1.bf16.msra.mxu0 %v3899_v1 }
  0x74   : > { %3902 = vmatprep.subr.bf16.mxu0 %v3901_v2  ;;  %v3959_v2 = vpack.c.bf16 %v3493_v62, %v3492_v61 }
  0x76   : > { %3454 = vmatmul.mubr.msk.f32.vlgmr.msra.gmra.mrb[0].mxu0 %vm549_vm0, %v890_v8 }
  0x77   : > { %3904 = vmatpush1.bf16.msra.mxu0 %v3903_v9  ;;  %1001 = vmatprep.mubr.f32.mxu0 %v4523_v7 }
  0x78   : > { %3906 = vmatprep.subr.bf16.mxu0 %v3905_v10  ;;  %v3962_v10 = vpack.c.bf16 %v3495_v5, %v3494_v4  ;;  %v3519_v5 = vld [vmem:[%s6420_s4 + $0x18] sm:$0x3f] }
  0x7a   : > { %3455 = vmatmul.mubr.msk.f32.gmra.mrb[2].mxu0 %vm549_vm0, %v891_v16 }
  0x7b   : > { %3908 = vmatpush1.bf16.msra.mxu0 %v3907_v15  ;;  %1007 = vmatprep.mubr.f32.mxu0 %v4523_v7 }
  0x7c   : > { %3910 = vmatprep.subr.bf16.mxu0 %v3909_v17  ;;  %v3965_v17 = vpack.c.bf16 %v3497_v13, %v3496_v12  ;;  %v3527_v13 = vld [vmem:[%s6421_s5 + $0xd0] sm:$0xff] }
  0x7e   : > { %3456 = vmatmul.mubr.msk.f32.gmra.mrb[4].mxu0 %vm549_vm0, %v892_v24  ;;  %v3501_v24 = vld [vmem:[%s6419_s3 + $0x100] sm:$0xff] }
  0x7f   : > { %3912 = vmatpush1.bf16.msra.mxu0 %v3911_v23  ;;  %1013 = vmatprep.mubr.f32.mxu0 %v4523_v7  ;;  %v3500_v23 = vld [vmem:[%s6419_s3 + $0xf8] sm:$0xff] }
  0x80   : > { %3914 = vmatprep.subr.bf16.mxu0 %v3913_v25  ;;  %v3971_v25 = vpack.c.bf16 %v3501_v24, %v3500_v23  ;;  %v3536_v23 = vld [vmem:[%s6421_s5 + $0x118] sm:$0xff]  ;;  %v3538_v24 = vld [vmem:[%s6421_s5 + $0x128] sm:$0xff] }
  0x82   : > { %3457 = vmatmul.mubr.msk.f32.gmra.mrb[6].mxu0 %vm549_vm0, %v893_v31 }
  0x83   : > { %3916 = vmatpush1.bf16.msra.mxu0 %v3915_v30  ;;  %1133 = vmatprep.mubr.f32.mxu0 %v4523_v7  ;;  %v3505_v30 = vld [vmem:[%s6419_s3 + $0x120] sm:$0xff] }
  0x84   : > { %3918 = vmatprep.subr.bf16.mxu0 %v3917_v32  ;;  %v3977_v31 = vpack.c.bf16 %v3505_v30, %v3504_v29  ;;  %v3506_v32 = vld [vmem:[%s6419_s3 + $0x128] sm:$0xff]  ;;  %v3540_v29 = vld [vmem:[%s6421_s5 + $0x138] sm:$0xff] }
  0x85   : > { %v3980_v34 = vpack.c.bf16 %v3507_v33, %v3506_v32  ;;  %v3542_v30 = vld [vmem:[%s6421_s5 + $0x148] sm:$0xff]  ;;  %v3539_v32 = vld [vmem:[%s6421_s5 + $0x130] sm:$0xff]  ;;  %v3541_v33 = vld [vmem:[%s6421_s5 + $0x140] sm:$0xff] }
  0x87   : > { %3920 = vmatpush1.bf16.msra.mxu0 %v3919_v37  ;;  %v3983_v37 = vpack.c.bf16 %v3509_v36, %v3508_v35  ;;  %v3544_v35 = vld [vmem:[%s6421_s5 + $0x158] sm:$0xf]  ;;  %v1599_v36 = vld [vmem:[%s6421_s5 + $0x8] sm:$0xff] }
  0x88   : > { %3922 = vmatprep.subr.bf16.mxu0 %v3921_v38  ;;  %v3510_v38 = vld [vmem:[%s6419_s3 + $0x148] sm:$0xff] }
  0x8b   : > { %3924 = vmatpush1.bf16.msra.mxu0 %v3923_v41 }
  0x8c   : > { %4105 = vmatprep.subr.bf16.mxu0 %v4524_v21 }
  0x8e   : > { %3482 = vmatmul.mubr.msk.f32.vlgmr.msra.gmra.mrb[0].mxu0 %vm549_vm0, %v1028_v42 }
  0x8f   : > { %1139 = vmatprep.mubr.f32.mxu0 %v4523_v7 }
  0x92   : > { %3483 = vmatmul.mubr.msk.f32.gmra.mrb[2].mxu0 %vm549_vm0, %v1029_v43 }
  0x93   : > { %1145 = vmatprep.mubr.f32.mxu0 %v4523_v7 }
  0x96   : > { %3484 = vmatmul.mubr.msk.f32.gmra.mrb[4].mxu0 %vm549_vm0, %v1030_v44 }
  0x97   : > { %1151 = vmatprep.mubr.f32.mxu0 %v4523_v7 }
  0x9a   : > { %3485 = vmatmul.mubr.msk.f32.gmra.mrb[6].mxu0 %vm549_vm0, %v1031_v45  ;;  %vm3221_vm0 = vcmask 130048  }
 0x161   : > { %v1135_v56 = vpop.f32.mrb[0].mxu0 }
 0x162   : > { %v1137_v57 = vpop.f32.mrb[1].mxu0  ;;  %v5174_v60 = vadd.f32 %v1171_v53, %v1135_v56 }
 0x163   : > { %v1179_v58 = vadd.f32 %v1175_v52, %v1137_v57 }
 0x165   : > { %v1141_v63 = vpop.f32.mrb[2].mxu0  ;;  %3486 = vmatprep.mubr.msk.f32.mxu1 %vm1207_vm1, %v1179_v58 }
 0x166   : > { %v1143_v0 = vpop.f32.mrb[3].mxu0  ;;  %1285 = vmatmul.mubr.f32.vlgmr.msra.gmra.mrb[0].mxu1 %v5174_v60  ;;  %v5186_v3 = vadd.f32 %v1171_v53, %v1141_v63 }
 0x167   : > { %v5184_v1 = vadd.f32 %v1175_v52, %v1143_v0  ;;  %3957 = vmatpush1.bf16.msra.mxu1 %v3956_v59  ;;  %v1417_v0 = vld [vmem:[%s6420_s4 + $0x8] sm:$0x3f] }
 0x168   : > { %3958 = vmatprep.subr.bf16.mxu1 %v4524_v21 }
 0x169   : > { %v1147_v6 = vpop.f32.mrb[4].mxu0  ;;  %3487 = vmatprep.mubr.msk.f32.mxu1 %vm1207_vm1, %v5184_v1 }
 0x16a   : > { %v1149_v8 = vpop.f32.mrb[5].mxu0  ;;  %1290 = vmatmul.mubr.f32.gmra.mrb[2].mxu1 %v5186_v3  ;;  %v1182_v11 = vadd.f32 %v1171_v53, %v1147_v6  ;;  %v3523_v6 = vld [vmem:[%s6421_s5 + $0xb0] sm:$0xff] }
 0x16b   : > { %v1183_v9 = vadd.f32 %v1175_v52, %v1149_v8  ;;  %3960 = vmatpush1.bf16.msra.mxu1 %v3959_v2  ;;  %v3524_v2 = vld [vmem:[%s6421_s5 + $0xb8] sm:$0xff]  ;;  %v3525_v8 = vld [vmem:[%s6421_s5 + $0xc0] sm:$0xff] }
 0x16c   : > { %3961 = vmatprep.subr.bf16.mxu1 %v4524_v21 }
 0x16d   : > { %v1153_v14 = vpop.f32.mrb[6].mxu0  ;;  %3488 = vmatprep.mubr.msk.f32.mxu1 %vm1207_vm1, %v1183_v9 }
 0x16e   : > { %v1155_v15 = vpop.f32.mrb[7].mxu0  ;;  %1295 = vmatmul.mubr.f32.gmra.mrb[4].mxu1 %v1182_v11  ;;  %v1184_v18 = vadd.f32 %v1171_v53, %v1153_v14  ;;  %v3529_v14 = vld [vmem:[%s6421_s5 + $0xe0] sm:$0xff] }
 0x16f   : > { %v1185_v16 = vadd.f32 %v1175_v52, %v1155_v15  ;;  %3963 = vmatpush1.bf16.msra.mxu1 %v3962_v10  ;;  %v3528_v10 = vld [vmem:[%s6421_s5 + $0xd8] sm:$0xff] }
 0x170   : > { %3964 = vmatprep.subr.bf16.mxu1 %v4524_v21  ;;  %v3532_v15 = vld [vmem:[%s6421_s5 + $0xf8] sm:$0xff] }
 0x171   : > { %3489 = vmatprep.mubr.msk.f32.mxu1 %vm1207_vm1, %v1185_v16 }
 0x172   : > { %1300 = vmatmul.mubr.f32.gmra.mrb[6].mxu1 %v1184_v18 }
 0x173   : > { %3966 = vmatpush1.bf16.msra.mxu1 %v3965_v17  ;;  %3511 = vmatprep.mubr.msk.f32.mxu1 %vm1207_vm1, %v1179_v58  ;;  %v3534_v17 = vld [vmem:[%s6421_s5 + $0x108] sm:$0xff] }
 0x174   : > { %3967 = vmatprep.subr.bf16.mxu1 %v4524_v21 }
 0x177   : > { %3969 = vmatpush1.bf16.msra.mxu1 %v3968_v22  ;;  %v4015_v22 = vpack.c.bf16 %v3533_v20, %v3531_v19  ;;  %v1602_v20 = vld [vmem:[%s6421_s5 + $0x20] sm:$0xff] }
 0x178   : > { %3970 = vmatprep.subr.bf16.mxu1 %v4524_v21 }
 0x17b   : > { %3972 = vmatpush1.bf16.msra.mxu1 %v3971_v25  ;;  %v4017_v25 = vpack.c.bf16 %v3538_v24, %v3536_v23  ;;  %v1607_v24 = vld [vmem:[%s6421_s5 + $0x48] sm:$0xff] }
 0x17c   : > { %3973 = vmatprep.subr.bf16.mxu1 %v4524_v21 }
 0x17f   : > { %3975 = vmatpush1.bf16.msra.mxu1 %v3974_v28  ;;  %v4019_v28 = vpack.c.bf16 %v3537_v27, %v3535_v26 }
 0x180   : > { %3976 = vmatprep.subr.bf16.mxu1 %v4524_v21 }
 0x183   : > { %3978 = vmatpush1.bf16.msra.mxu1 %v3977_v31  ;;  %v4021_v31 = vpack.c.bf16 %v3542_v30, %v3540_v29  ;;  %v1608_v29 = vld [vmem:[%s6421_s5 + $0x50] sm:$0xff] }
 0x184   : > { %3979 = vmatprep.subr.bf16.mxu1 %v4524_v21 }
 0x187   : > { %3981 = vmatpush1.bf16.msra.mxu1 %v3980_v34  ;;  %v4023_v34 = vpack.c.bf16 %v3541_v33, %v3539_v32  ;;  %v1613_v32 = vld [vmem:[%s6421_s5 + $0x78] sm:$0xff] }
 0x188   : > { %3982 = vmatprep.subr.bf16.mxu1 %v4524_v21 }
 0x18b   : > { %3984 = vmatpush1.bf16.msra.mxu1 %v3983_v37  ;;  %v1601_v37 = vld [vmem:[%s6421_s5 + $0x18] sm:$0xff] }
 0x18c   : > { %1367 = vmatprep.subr.mxu1 %v4523_v7 }
 0x18f   : > { %1368 = vmatpush1.msra.mxu1 %v3510_v38  ;;  %v3543_v38 = vld [vmem:[%s6421_s5 + $0x150] sm:$0xf] }
 0x190   : > { %1392 = vmatmul.mubr.f32.vlgmr.msra.gmra.mrb[8].mxu1 %v5174_v60 }
 0x191   : > { %3512 = vmatprep.mubr.msk.f32.mxu1 %vm1207_vm1, %v5184_v1  ;;  %v3518_v1 = vld [vmem:[%s6420_s4 + $0x10] sm:$0xff] }
 0x194   : > { %1397 = vmatmul.mubr.f32.gmra.mrb[10].mxu1 %v5186_v3  ;;  %v3526_v3 = vld [vmem:[%s6421_s5 + $0xc8] sm:$0xff] }
 0x195   : > { %3513 = vmatprep.mubr.msk.f32.mxu1 %vm1207_vm1, %v1183_v9  ;;  %v4005_v4 = vpack.c.bf16 %v3526_v3, %v3524_v2  ;;  %v4007_v9 = vpack.c.bf16 %v3525_v8, %v3523_v6  ;;  %v2208_v6 = vld [vmem:[%s6423_s7 + $0x78] sm:$0xff] }
 0x198   : > { %1402 = vmatmul.mubr.f32.gmra.mrb[12].mxu1 %v1182_v11  ;;  %v3530_v11 = vld [vmem:[%s6421_s5 + $0xe8] sm:$0xff] }
 0x199   : > { %3514 = vmatprep.mubr.msk.f32.mxu1 %vm1207_vm1, %v1185_v16  ;;  %v4009_v12 = vpack.c.bf16 %v3530_v11, %v3528_v10  ;;  %v4011_v16 = vpack.c.bf16 %v3529_v14, %v3527_v13  ;;  %v2209_v11 = vld [vmem:[%s6423_s7 + $0x80] sm:$0xff]  ;;  %v1600_v14 = vld [vmem:[%s6421_s5 + $0x10] sm:$0xff] }
 0x19a   : > { %v1598_v13 = vld [vmem:[%s6421_s5] sm:$0xff] }
 0x19c   : > { %1407 = vmatmul.mubr.f32.gmra.mrb[14].mxu1 %v1184_v18  ;;  %v4013_v18 = vpack.c.bf16 %v3534_v17, %v3532_v15  ;;  %v1603_v15 = vld [vmem:[%s6421_s5 + $0x28] sm:$0xff] }
 0x19d   : > { %3777 = vmatprep.mubr.msk.f32.mxu1 %vm1418_vm2, %v1416_v39  ;;  %v4025_v39 = vpack.c.bf16 %v1601_v37, %v1599_v36  ;;  %v1612_v36 = vld [vmem:[%s6421_s5 + $0x70] sm:$0xff]  ;;  %v1615_v37 = vld [vmem:[%s6421_s5 + $0x88] sm:$0xff] }
 0x239   : > { %v1286_v40 = vpop.f32.mrb[0].mxu1 }
 0x23a   : > { %v1288_v41 = vpop.f32.mrb[1].mxu1 }
 0x23b   : > { %v2194_v41 = vld [vmem:[%s6423_s7 + $0x8] sm:$0xff] }
 0x23d   : > { %v1291_v42 = vpop.f32.mrb[2].mxu1 }
 0x23e   : > { %v1293_v43 = vpop.f32.mrb[3].mxu1 }
 0x241   : > { %v1296_v44 = vpop.f32.mrb[4].mxu1 }
 0x242   : > { %v1298_v45 = vpop.f32.mrb[5].mxu1 }
 0x245   : > { %v1301_v46 = vpop.f32.mrb[6].mxu1 }
 0x246   : > { %v1303_v47 = vpop.f32.mrb[7].mxu1 }
 0x247   : > { %v2198_v47 = vld [vmem:[%s6423_s7 + $0x28] sm:$0xff] }
 0x263   : > { %v1393_v48 = vpop.f32.mrb[8].mxu1 }
 0x264   : > { %v1412_v50 = vmax.f32 %v1286_v40, %v1393_v48  ;;  %v1395_v52 = vpop.f32.mrb[9].mxu1  ;;  %v2193_v40 = vld [vmem:[%s6423_s7] sm:$0xff] }
 0x265   : > { %v4106_v43 = vpack.c.bf16 %v2194_v41, %v2193_v40  ;;  %v2200_v52 = vld [vmem:[%s6423_s7 + $0x38] sm:$0xff]  ;;  %v1614_v41 = vld [vmem:[%s6421_s5 + $0x80] sm:$0xff] }
 0x267   : > { %v1398_v53 = vpop.f32.mrb[10].mxu1  ;;  %4107 = vmatpush1.bf16.msra.mxu0 %v4106_v43 }
 0x268   : > { %v1413_v54 = vmax.f32 %v1291_v42, %v1398_v53  ;;  %v1400_v55 = vpop.f32.mrb[11].mxu1  ;;  %v2195_v42 = vld [vmem:[%s6423_s7 + $0x10] sm:$0xff]  ;;  %4108 = vmatprep.subr.bf16.mxu0 %v4524_v21 }
 0x269   : > { %v2202_v55 = vld [vmem:[%s6423_s7 + $0x48] sm:$0xff] }
 0x26a   : > { %v3985_v56 = vpack.c.bf16 %v1413_v54, %v1412_v50  ;;  %v2199_v50 = vld [vmem:[%s6423_s7 + $0x30] sm:$0xff]  ;;  %v2201_v54 = vld [vmem:[%s6423_s7 + $0x40] sm:$0xff] }
 0x26b   : > { %v1403_v57 = vpop.f32.mrb[12].mxu1  ;;  %v4115_v53 = vpack.c.bf16 %v2200_v52, %v2199_v50  ;;  %v3558_v50 = vld [vmem:[%s6421_s5 + $0x188] sm:$0xff]  ;;  %v3560_v52 = vld [vmem:[%s6421_s5 + $0x198] sm:$0xff] }
 0x26c   : > { %v1414_v58 = vmax.f32 %v1296_v44, %v1403_v57  ;;  %v1405_v59 = vpop.f32.mrb[13].mxu1  ;;  %3986 = vmatprep.subr.bf16.mxu1 %v3985_v56  ;;  %v2196_v44 = vld [vmem:[%s6423_s7 + $0x18] sm:$0xff] }
 0x26d   : > { %3988 = vmatpush3.bf16.msra.mxu1 %v3985_v56  ;;  %v4109_v45 = vpack.c.bf16 %v2196_v44, %v2195_v42  ;;  %v2203_v59 = vld [vmem:[%s6423_s7 + $0x50] sm:$0xff]  ;;  %v1619_v44 = vld [vmem:[%s6421_s5 + $0xa8] sm:$0xf] }
 0x26e   : > { %v1616_v42 = vld [vmem:[%s6421_s5 + $0x90] sm:$0xff] }
 0x26f   : > { %v1408_v60 = vpop.f32.mrb[14].mxu1  ;;  %4110 = vmatpush1.bf16.msra.mxu0 %v4109_v45  ;;  %v4043_v43 = vpack.c.bf16 %v1616_v42, %v1614_v41  ;;  %v3554_v45 = vld [vmem:[%s6421_s5 + $0x168] sm:$0xff] }
 0x270   : > { %v1415_v61 = vmax.f32 %v1301_v46, %v1408_v60  ;;  %v1410_v62 = vpop.f32.mrb[15].mxu1  ;;  %v2197_v46 = vld [vmem:[%s6423_s7 + $0x20] sm:$0xff]  ;;  %4111 = vmatprep.subr.bf16.mxu0 %v4524_v21  ;;  %v2204_v60 = vld [vmem:[%s6423_s7 + $0x58] sm:$0xff] }
 0x271   : > { %v4112_v48 = vpack.c.bf16 %v2198_v47, %v2197_v46  ;;  %v2205_v62 = vld [vmem:[%s6423_s7 + $0x60] sm:$0xff]  ;;  %v3556_v46 = vld [vmem:[%s6421_s5 + $0x178] sm:$0xff] }
 0x272   : > { %v3989_v63 = vpack.c.bf16 %v1415_v61, %v1414_v58  ;;  %v4118_v58 = vpack.c.bf16 %v2202_v55, %v2201_v54  ;;  %v4121_v61 = vpack.c.bf16 %v2204_v60, %v2203_v59  ;;  %v3553_v47 = vld [vmem:[%s6421_s5 + $0x160] sm:$0xff]  ;;  %v4045_v54 = vpack.c.bf16 %v3556_v46, %v3554_v45  ;;  %v3562_v60 = vld [vmem:[%s6421_s5 + $0x1a8] sm:$0xff]  ;;  %v3596_v45 = vld [vmem:[%s6421_s5 + $0x298] sm:$0xff] }
 0x273   : > { %4113 = vmatpush1.bf16.msra.mxu0 %v4112_v48  ;;  %v3555_v48 = vld [vmem:[%s6421_s5 + $0x170] sm:$0xff]  ;;  %v3598_v46 = vld [vmem:[%s6421_s5 + $0x2a8] sm:$0xff] }
 0x274   : > { %3991 = vmatprep.subr.msk.bf16.mxu1 %vm3990_vm5, %v3989_v63  ;;  %4114 = vmatprep.subr.bf16.mxu0 %v4524_v21  ;;  %v4047_v55 = vpack.c.bf16 %v3555_v48, %v3553_v47  ;;  %v4081_v48 = vpack.c.bf16 %v3598_v46, %v3596_v45 }
 0x275   : > { %3994 = vmatpush3.bf16.msk.msra.mxu1 %vm3990_vm5, %v3989_v63 }
 0x276   : > { %3996 = vmatprep.subr.bf16.mxu1 %v3985_v56 }
 0x277   : > { %4116 = vmatpush1.bf16.msra.mxu0 %v4115_v53  ;;  %v1618_v53 = vld [vmem:[%s6421_s5 + $0xa0] sm:$0xf] }
 0x278   : > { %3778 = vmatmul.mubr.msk.f32.vlgmr.msra.gmra.mrb[16].mxu1 %vm1418_vm2, %v1417_v0  ;;  %4117 = vmatprep.subr.bf16.mxu0 %v4524_v21 }
 0x279   : > { %3998 = vmatpush3.bf16.msra.mxu1 %v3985_v56  ;;  %3788 = vmatprep.mubr.msk.f32.mxu1 %vm1418_vm2, %v3518_v1 }
 0x27a   : > { %4001 = vmatprep.subr.msk.bf16.mxu1 %vm3990_vm5, %v3989_v63 }
 0x27b   : > { %4119 = vmatpush1.bf16.msra.mxu0 %v4118_v58  ;;  %v3559_v58 = vld [vmem:[%s6421_s5 + $0x190] sm:$0xff] }
 0x27c   : > { %4120 = vmatprep.subr.bf16.mxu0 %v4524_v21 }
 0x27d   : > { %4004 = vmatpush3.bf16.msk.msra.mxu1 %vm3990_vm5, %v3989_v63  ;;  %v2206_v63 = vld [vmem:[%s6423_s7 + $0x68] sm:$0xff] }
 0x27e   : > { %4006 = vmatprep.subr.bf16.mxu1 %v4005_v4  ;;  %v4124_v3 = vpack.c.bf16 %v2206_v63, %v2205_v62 }
 0x27f   : > { %4122 = vmatpush1.bf16.msra.mxu0 %v4121_v61  ;;  %v3564_v61 = vld [vmem:[%s6421_s5 + $0x1b8] sm:$0xff] }
 0x280   : > { %3789 = vmatmul.mubr.msk.f32.vlgmr.msra.gmra.mrb[18].mxu1 %vm1418_vm2, %v3519_v5  ;;  %4123 = vmatprep.subr.bf16.mxu0 %v4524_v21  ;;  %v2207_v5 = vld [vmem:[%s6423_s7 + $0x70] sm:$0xff]  ;;  %v4053_v63 = vpack.c.bf16 %v3564_v61, %v3562_v60  ;;  %v3612_v60 = vld [vmem:[%s6421_s5 + $0x2f8] sm:$0xff] }
 0x281   : > { %1721 = vmatprep.mubr.f32.mxu1 %v4523_v7  ;;  %4008 = vmatpush1.bf16.msra.mxu1 %v4007_v9  ;;  %v4127_v10 = vpack.c.bf16 %v2208_v6, %v2207_v5  ;;  %v3599_v61 = vld [vmem:[%s6421_s5 + $0x2b0] sm:$0xf] }
 0x282   : > { %4010 = vmatprep.subr.bf16.mxu1 %v4009_v12  ;;  %v2210_v12 = vld [vmem:[%s6423_s7 + $0x88] sm:$0xff] }
 0x283   : > { %4125 = vmatpush1.bf16.msra.mxu0 %v4124_v3  ;;  %v4130_v17 = vpack.c.bf16 %v2210_v12, %v2209_v11  ;;  %v3566_v3 = vld [vmem:[%s6421_s5 + $0x1c8] sm:$0xff]  ;;  %v3572_v11 = vld [vmem:[%s6421_s5 + $0x1f8] sm:$0xff] }
 0x284   : > { %4126 = vmatprep.subr.bf16.mxu0 %v4524_v21 }
 0x285   : > { %4012 = vmatpush1.bf16.msra.mxu1 %v4011_v16  ;;  %v1605_v16 = vld [vmem:[%s6421_s5 + $0x38] sm:$0xff] }
 0x286   : > { %4014 = vmatprep.subr.bf16.mxu1 %v4013_v18  ;;  %v4027_v18 = vpack.c.bf16 %v1600_v14, %v1598_v13  ;;  %v4029_v19 = vpack.c.bf16 %v1605_v16, %v1603_v15  ;;  %v3569_v14 = vld [vmem:[%s6421_s5 + $0x1e0] sm:$0xff]  ;;  %v3571_v15 = vld [vmem:[%s6421_s5 + $0x1f0] sm:$0xff] }
 0x287   : > { %4128 = vmatpush1.bf16.msra.mxu0 %v4127_v10  ;;  %v3570_v10 = vld [vmem:[%s6421_s5 + $0x1e8] sm:$0xff]  ;;  %v4063_v16 = vpack.c.bf16 %v3571_v15, %v3569_v14 }
 0x288   : > { %4129 = vmatprep.subr.bf16.mxu0 %v4524_v21  ;;  %v4061_v13 = vpack.c.bf16 %v3572_v11, %v3570_v10  ;;  %v3615_v10 = vld [vmem:[%s6421_s5 + $0x310] sm:$0xff] }
 0x289   : > { %4016 = vmatpush1.bf16.msra.mxu1 %v4015_v22  ;;  %v1604_v22 = vld [vmem:[%s6421_s5 + $0x30] sm:$0xff] }
 0x28a   : > { %4018 = vmatprep.subr.bf16.mxu1 %v4017_v25  ;;  %v1609_v25 = vld [vmem:[%s6421_s5 + $0x58] sm:$0xff]  ;;  %v4031_v26 = vpack.c.bf16 %v1604_v22, %v1602_v20  ;;  %v3579_v20 = vld [vmem:[%s6421_s5 + $0x210] sm:$0xff]  ;;  %v3581_v22 = vld [vmem:[%s6421_s5 + $0x220] sm:$0xff] }
 0x28b   : > { %4131 = vmatpush1.bf16.msra.mxu0 %v4130_v17  ;;  %v4033_v27 = vpack.c.bf16 %v1609_v25, %v1607_v24  ;;  %v3574_v17 = vld [vmem:[%s6421_s5 + $0x208] sm:$0xf]  ;;  %v3573_v25 = vld [vmem:[%s6421_s5 + $0x200] sm:$0xf] }
 0x28c   : > { %4132 = vmatprep.subr.bf16.mxu0 %v4524_v21  ;;  %v3586_v24 = vld [vmem:[%s6421_s5 + $0x248] sm:$0xff] }
 0x28d   : > { %4020 = vmatpush1.bf16.msra.mxu1 %v4019_v28  ;;  %v1606_v28 = vld [vmem:[%s6421_s5 + $0x40] sm:$0xff] }
 0x28e   : > { %4022 = vmatprep.subr.bf16.mxu1 %v4021_v31  ;;  %v1611_v31 = vld [vmem:[%s6421_s5 + $0x68] sm:$0xff]  ;;  %v4035_v33 = vpack.c.bf16 %v1608_v29, %v1606_v28  ;;  %v3583_v29 = vld [vmem:[%s6421_s5 + $0x230] sm:$0xff] }
 0x291   : > { %4024 = vmatpush1.bf16.msra.mxu1 %v4023_v34  ;;  %v4037_v34 = vpack.c.bf16 %v1613_v32, %v1611_v31  ;;  %v3588_v32 = vld [vmem:[%s6421_s5 + $0x258] sm:$0xff] }
 0x292   : > { %3545 = vmatprep.subr.msk.mxu1 %vm1425_vm3, %v3544_v35  ;;  %v1610_v35 = vld [vmem:[%s6421_s5 + $0x60] sm:$0xff] }
 0x295   : > { %3546 = vmatpush1.msk.msra.mxu1 %vm1425_vm3, %v3543_v38  ;;  %v1617_v38 = vld [vmem:[%s6421_s5 + $0x98] sm:$0xff] }
 0x296   : > { %4026 = vmatprep.subr.bf16.mxu1 %v4025_v39  ;;  %v4039_v39 = vpack.c.bf16 %v1612_v36, %v1610_v35  ;;  %v4041_v40 = vpack.c.bf16 %v1617_v38, %v1615_v37  ;;  %v3587_v36 = vld [vmem:[%s6421_s5 + $0x250] sm:$0xff]  ;;  %v3589_v37 = vld [vmem:[%s6421_s5 + $0x260] sm:$0xff] }
 0x297   : > { %v4075_v41 = vpack.c.bf16 %v3589_v37, %v3587_v36  ;;  %v3633_v36 = vld [vmem:[%s6423_s7 + $0xa0] sm:$0xff]  ;;  %v3634_v37 = vld [vmem:[%s6423_s7 + $0xa8] sm:$0xff] }
 0x34b   : > { %v3779_v56 = vpop.f32.mrb[16].mxu1 }
 0x34c   : > { %v1495_v57 = vpop.f32.mrb[17].mxu1 }
 0x353   : > { %v3790_v0 = vpop.f32.mrb[18].mxu1 }
 0x354   : > { %v1589_v1 = vmax.f32 %v3779_v56, %v3790_v0  ;;  %v1579_v2 = vpop.f32.mrb[19].mxu1  ;;  %v4049_v56 = vpack.c.bf16 %v3560_v52, %v3558_v50  ;;  %v3561_v0 = vld [vmem:[%s6421_s5 + $0x1a0] sm:$0xff]  ;;  %v3595_v50 = vld [vmem:[%s6421_s5 + $0x290] sm:$0xff] }
 0x355   : > { %v1588_v4 = vmax.f32 %v1495_v57, %v1579_v2  ;;  %v3557_v57 = vld [vmem:[%s6421_s5 + $0x180] sm:$0xff] }
 0x356   : > { %v1591_v8 = vmax.f32 %v1589_v1, 0.0  ;;  %v4051_v62 = vpack.c.bf16 %v3559_v58, %v3557_v57  ;;  %v3563_v1 = vld [vmem:[%s6421_s5 + $0x1b0] sm:$0xff]  ;;  %v3597_v52 = vld [vmem:[%s6421_s5 + $0x2a0] sm:$0xff] }
 0x357   : > { %v1590_v9 = vmax.f32 %v1588_v4, 0.0  ;;  %v3568_v4 = vld [vmem:[%s6421_s5 + $0x1d8] sm:$0xff]  ;;  %v4055_v5 = vpack.c.bf16 %v3563_v1, %v3561_v0  ;;  %v3605_v57 = vld [vmem:[%s6421_s5 + $0x2c0] sm:$0xff]  ;;  %v3607_v58 = vld [vmem:[%s6421_s5 + $0x2d0] sm:$0xff] }
 0x358   : > { %1595 = vst.msk [vmem:[#allocation2 + $0x8] sm:$0x3f] %vm1594_vm6, %v1591_v8  ;;  %v4057_v6 = vpack.c.bf16 %v3568_v4, %v3566_v3  ;;  %v3565_v8 = vld [vmem:[%s6421_s5 + $0x1c0] sm:$0xff]  ;;  %v3614_v4 = vld [vmem:[%s6421_s5 + $0x308] sm:$0xff] }
 0x359   : > { %1593 = vst.msk [vmem:[#allocation2] sm:$0xff] %vm1592_vm7, %v1590_v9  ;;  %v3567_v9 = vld [vmem:[%s6421_s5 + $0x1d0] sm:$0xff]  ;;  %v3609_v1 = vld [vmem:[%s6421_s5 + $0x2e0] sm:$0xff] }
 0x35a   : > { %v4059_v12 = vpack.c.bf16 %v3567_v9, %v3565_v8  ;;  %v3613_v9 = vld [vmem:[%s6421_s5 + $0x300] sm:$0xff] }
 0x35b   : > { %v4095_v14 = vpack.c.bf16 %v3615_v10, %v3613_v9  ;;  %v3651_v10 = vld [vmem:[%s6423_s7 + $0x130] sm:$0xff] }
 0x35f   : > { %v1621_v30 = vld [vmem:[#allocation2 + $0x9] sm:$0x3]  ;;  %v1942_v11 = vld [vmem:[#allocation2 + $0xb] sm:$0x3] }
 0x360   : > { %v1620_v23 = vld [vmem:[#allocation2 + $0x1] sm:$0xff]  ;;  %v1824_v38 = vld [vmem:[#allocation2 + $0xa] sm:$0x3] }
 0x361   : > { %3547 = vmatmul.mubr.msk.f32.vlgmr.msra.gmra.mrb[20].mxu1 %vm1592_vm7, %v1620_v23  ;;  %v1596_v59 = vld [vmem:[#allocation2] sm:$0xff]  ;;  %v1597_v2 = vld [vmem:[#allocation2 + $0x8] sm:$0x3]  ;;  %v3584_v23 = vld [vmem:[%s6421_s5 + $0x238] sm:$0xff] }
 0x362   : > { %4028 = vmatpush1.bf16.msra.mxu1 %v4027_v18  ;;  %1727 = vmatprep.mubr.f32.mxu1 %v4523_v7  ;;  %v3580_v18 = vld [vmem:[%s6421_s5 + $0x218] sm:$0xff]  ;;  %v4069_v28 = vpack.c.bf16 %v3586_v24, %v3584_v23  ;;  %v1823_v31 = vld [vmem:[#allocation2 + $0x2] sm:$0xff]  ;;  %v3623_v24 = vld [vmem:[%s6421_s5 + $0x350] sm:$0xff] }
 0x363   : > { %4030 = vmatprep.subr.bf16.mxu1 %v4029_v19  ;;  %v3582_v19 = vld [vmem:[%s6421_s5 + $0x228] sm:$0xff]  ;;  %v3621_v23 = vld [vmem:[%s6421_s5 + $0x340] sm:$0xff] }
 0x364   : > { %v1941_v3 = vld [vmem:[#allocation2 + $0x3] sm:$0xff] }
 0x365   : > { %3548 = vmatmul.mubr.msk.f32.gmra.mrb[22].mxu1 %vm1592_vm7, %v1621_v30  ;;  %v3585_v30 = vld [vmem:[%s6421_s5 + $0x240] sm:$0xff] }
 0x366   : > { %4032 = vmatpush1.bf16.msra.mxu1 %v4031_v26  ;;  %1810 = vmatprep.mubr.f32.mxu1 %v4523_v7  ;;  %v4065_v26 = vpack.c.bf16 %v3582_v19, %v3580_v18  ;;  %v3622_v18 = vld [vmem:[%s6421_s5 + $0x348] sm:$0xff]  ;;  %v3624_v19 = vld [vmem:[%s6421_s5 + $0x358] sm:$0xff] }
 0x367   : > { %4034 = vmatprep.subr.bf16.mxu1 %v4033_v27  ;;  %v4067_v27 = vpack.c.bf16 %v3581_v22, %v3579_v20  ;;  %v4101_v22 = vpack.c.bf16 %v3624_v19, %v3622_v18 }
 0x36a   : > { %4036 = vmatpush1.bf16.msra.mxu1 %v4035_v33  ;;  %v3590_v33 = vld [vmem:[%s6421_s5 + $0x268] sm:$0xff] }
 0x36b   : > { %4038 = vmatprep.subr.bf16.mxu1 %v4037_v34  ;;  %v4071_v34 = vpack.c.bf16 %v3585_v30, %v3583_v29  ;;  %v4073_v35 = vpack.c.bf16 %v3590_v33, %v3588_v32  ;;  %v2060_v29 = vld [vmem:[#allocation2 + $0xc] sm:$0x3]  ;;  %v2211_v30 = vld [vmem:[%s6423_s7 + $0x90] sm:$0xff]  ;;  %v2177_v33 = vld [vmem:[%s6422_s6] sm:$0x3] }
 0x36e   : > { %4040 = vmatpush1.bf16.msra.mxu1 %v4039_v39  ;;  %v3592_v39 = vld [vmem:[%s6421_s5 + $0x278] sm:$0xff] }
 0x36f   : > { %4042 = vmatprep.subr.bf16.mxu1 %v4041_v40  ;;  %v3594_v40 = vld [vmem:[%s6421_s5 + $0x288] sm:$0xff] }
 0x370   : > { %v4077_v42 = vpack.c.bf16 %v3594_v40, %v3592_v39 }
 0x372   : > { %4044 = vmatpush1.bf16.msra.mxu1 %v4043_v43  ;;  %v3591_v43 = vld [vmem:[%s6421_s5 + $0x270] sm:$0xff] }
 0x373   : > { %3549 = vmatprep.subr.msk.mxu1 %vm1425_vm3, %v1619_v44  ;;  %v3593_v44 = vld [vmem:[%s6421_s5 + $0x280] sm:$0xff] }
 0x374   : > { %v4079_v47 = vpack.c.bf16 %v3593_v44, %v3591_v43  ;;  %v3635_v43 = vld [vmem:[%s6423_s7 + $0xb0] sm:$0xff]  ;;  %v3636_v44 = vld [vmem:[%s6423_s7 + $0xb8] sm:$0xff] }
 0x376   : > { %3550 = vmatpush1.msk.msra.mxu1 %vm1425_vm3, %v1618_v53  ;;  %v4083_v53 = vpack.c.bf16 %v3597_v52, %v3595_v50  ;;  %v3637_v52 = vld [vmem:[%s6423_s7 + $0xc0] sm:$0xff] }
 0x377   : > { %3551 = vmatmul.mubr.msk.f32.vlgmr.msra.gmra.mrb[20].mxu1 %vm1592_vm7, %v1596_v59  ;;  %4046 = vmatprep.subr.bf16.mxu1 %v4045_v54  ;;  %v3600_v54 = vld [vmem:[%s6421_s5 + $0x2b8] sm:$0xf]  ;;  %v3610_v59 = vld [vmem:[%s6421_s5 + $0x2e8] sm:$0xff] }
 0x378   : > { %4048 = vmatpush1.bf16.msra.mxu1 %v4047_v55  ;;  %1816 = vmatprep.mubr.f32.mxu1 %v4523_v7  ;;  %v3606_v55 = vld [vmem:[%s6421_s5 + $0x2c8] sm:$0xff]  ;;  %v4089_v0 = vpack.c.bf16 %v3612_v60, %v3610_v59 }
 0x379   : > { %4050 = vmatprep.subr.bf16.mxu1 %v4049_v56  ;;  %v3608_v56 = vld [vmem:[%s6421_s5 + $0x2d8] sm:$0xff]  ;;  %v3642_v59 = vld [vmem:[%s6423_s7 + $0xe8] sm:$0xff] }
 0x37b   : > { %3552 = vmatmul.mubr.msk.f32.gmra.mrb[22].mxu1 %vm1592_vm7, %v1597_v2  ;;  %v3611_v2 = vld [vmem:[%s6421_s5 + $0x2f0] sm:$0xff] }
 0x37c   : > { %4052 = vmatpush1.bf16.msra.mxu1 %v4051_v62  ;;  %1924 = vmatprep.mubr.f32.mxu1 %v4523_v7  ;;  %v4085_v62 = vpack.c.bf16 %v3608_v56, %v3606_v55  ;;  %v3639_v55 = vld [vmem:[%s6423_s7 + $0xd0] sm:$0xff]  ;;  %v3640_v56 = vld [vmem:[%s6423_s7 + $0xd8] sm:$0xff] }
 0x37d   : > { %4054 = vmatprep.subr.bf16.mxu1 %v4053_v63  ;;  %v4087_v63 = vpack.c.bf16 %v3607_v58, %v3605_v57  ;;  %v4145_v57 = vpack.c.bf16 %v3640_v56, %v3639_v55  ;;  %v3641_v58 = vld [vmem:[%s6423_s7 + $0xe0] sm:$0xff] }
 0x37e   : > { %v4148_v60 = vpack.c.bf16 %v3642_v59, %v3641_v58  ;;  %v3676_v55 = vld [vmem:[%s6425_s9 + $0x120] sm:$0xff]  ;;  %v2553_v58 = vld [vmem:[%s6425_s9 + $0x8] sm:$0xff]  ;;  %v2555_v59 = vld [vmem:[%s6425_s9 + $0x18] sm:$0xff] }
 0x380   : > { %4056 = vmatpush1.bf16.msra.mxu1 %v4055_v5  ;;  %v3616_v5 = vld [vmem:[%s6421_s5 + $0x318] sm:$0xff] }
 0x381   : > { %4058 = vmatprep.subr.bf16.mxu1 %v4057_v6  ;;  %v4091_v6 = vpack.c.bf16 %v3611_v2, %v3609_v1  ;;  %v4093_v8 = vpack.c.bf16 %v3616_v5, %v3614_v4  ;;  %v3646_v1 = vld [vmem:[%s6423_s7 + $0x108] sm:$0xff]  ;;  %v3648_v4 = vld [vmem:[%s6423_s7 + $0x118] sm:$0xff] }
 0x384   : > { %4060 = vmatpush1.bf16.msra.mxu1 %v4059_v12  ;;  %v3618_v12 = vld [vmem:[%s6421_s5 + $0x328] sm:$0xff] }
 0x385   : > { %4062 = vmatprep.subr.bf16.mxu1 %v4061_v13  ;;  %v3620_v13 = vld [vmem:[%s6421_s5 + $0x338] sm:$0xff] }
 0x386   : > { %v4097_v15 = vpack.c.bf16 %v3620_v13, %v3618_v12 }
 0x388   : > { %4064 = vmatpush1.bf16.msra.mxu1 %v4063_v16  ;;  %v3617_v16 = vld [vmem:[%s6421_s5 + $0x320] sm:$0xff] }
 0x389   : > { %3575 = vmatprep.subr.msk.mxu1 %vm1425_vm3, %v3574_v17  ;;  %v3619_v17 = vld [vmem:[%s6421_s5 + $0x330] sm:$0xff] }
 0x38a   : > { %v4099_v20 = vpack.c.bf16 %v3619_v17, %v3617_v16 }
 0x38c   : > { %3576 = vmatpush1.msk.msra.mxu1 %vm1425_vm3, %v3573_v25  ;;  %v4103_v25 = vpack.c.bf16 %v3623_v24, %v3621_v23 }
 0x38d   : > { %3577 = vmatmul.mubr.msk.f32.vlgmr.msra.gmra.mrb[20].mxu1 %vm1592_vm7, %v1823_v31  ;;  %4066 = vmatprep.subr.bf16.mxu1 %v4065_v26  ;;  %v3626_v26 = vld [vmem:[%s6421_s5 + $0x368] sm:$0xf]  ;;  %v2212_v31 = vld [vmem:[%s6423_s7 + $0x98] sm:$0xff] }
 0x38e   : > { %4068 = vmatpush1.bf16.msra.mxu1 %v4067_v27  ;;  %1930 = vmatprep.mubr.f32.mxu1 %v4523_v7  ;;  %v3625_v27 = vld [vmem:[%s6421_s5 + $0x360] sm:$0xf]  ;;  %v4133_v32 = vpack.c.bf16 %v2212_v31, %v2211_v30  ;;  %v3662_v30 = vld [vmem:[%s6425_s9 + $0xb0] sm:$0xff]  ;;  %v3665_v31 = vld [vmem:[%s6425_s9 + $0xc8] sm:$0xff] }
 0x38f   : > { %4070 = vmatprep.subr.bf16.mxu1 %v4069_v28  ;;  %v2059_v28 = vld [vmem:[#allocation2 + $0x4] sm:$0xff] }
 0x390   : > { %4134 = vmatpush1.bf16.msra.mxu0 %v4133_v32  ;;  %v3667_v32 = vld [vmem:[%s6425_s9 + $0xd8] sm:$0xff] }
 0x391   : > { %3578 = vmatmul.mubr.msk.f32.gmra.mrb[22].mxu1 %vm1592_vm7, %v1824_v38  ;;  %4135 = vmatprep.subr.bf16.mxu0 %v4524_v21 }
 0x392   : > { %4072 = vmatpush1.bf16.msra.mxu1 %v4071_v34  ;;  %2042 = vmatprep.mubr.f32.mxu1 %v4523_v7  ;;  %v2186_v34 = vrot.slane %v2177_v33, %v5159_v49 }
 0x393   : > { %4074 = vmatprep.subr.bf16.mxu1 %v4073_v35  ;;  %v2182_v35 = vrot.slane %v2177_v33, %v5164_v51  ;;  %v3657_v33 = vld [vmem:[%s6424_s8 + $0x8] sm:$0x1f] }
 0x396   : > { %4076 = vmatpush1.bf16.msra.mxu1 %v4075_v41  ;;  %v4136_v41 = vpack.c.bf16 %v3634_v37, %v3633_v36  ;;  %v3664_v36 = vld [vmem:[%s6425_s9 + $0xc0] sm:$0xff]  ;;  %v3666_v37 = vld [vmem:[%s6425_s9 + $0xd0] sm:$0xff] }
 0x397   : > { %4078 = vmatprep.subr.bf16.mxu1 %v4077_v42 }
 0x39a   : > { %4080 = vmatpush1.bf16.msra.mxu1 %v4079_v47 }
 0x39b   : > { %4082 = vmatprep.subr.bf16.mxu1 %v4081_v48  ;;  %v4139_v48 = vpack.c.bf16 %v3636_v44, %v3635_v43  ;;  %v3670_v43 = vld [vmem:[%s6425_s9 + $0xf0] sm:$0xff] }
 0x39e   : > { %4084 = vmatpush1.bf16.msra.mxu1 %v4083_v53  ;;  %v3638_v53 = vld [vmem:[%s6423_s7 + $0xc8] sm:$0xff] }
 0x39f   : > { %3601 = vmatprep.subr.msk.mxu1 %vm1425_vm3, %v3600_v54  ;;  %v4142_v54 = vpack.c.bf16 %v3638_v53, %v3637_v52  ;;  %v3677_v53 = vld [vmem:[%s6425_s9 + $0x128] sm:$0xff] }
 0x3a2   : > { %3602 = vmatpush1.msk.msra.mxu1 %vm1425_vm3, %v3599_v61  ;;  %v3643_v61 = vld [vmem:[%s6423_s7 + $0xf0] sm:$0xff] }
 0x3a3   : > { %3603 = vmatmul.mubr.msk.f32.vlgmr.msra.gmra.mrb[20].mxu1 %vm1592_vm7, %v1941_v3  ;;  %4086 = vmatprep.subr.bf16.mxu1 %v4085_v62  ;;  %v3644_v62 = vld [vmem:[%s6423_s7 + $0xf8] sm:$0xff]  ;;  %v3647_v3 = vld [vmem:[%s6423_s7 + $0x110] sm:$0xff] }
 0x3a4   : > { %4088 = vmatpush1.bf16.msra.mxu1 %v4087_v63  ;;  %2048 = vmatprep.mubr.f32.mxu1 %v4523_v7  ;;  %v4151_v63 = vpack.c.bf16 %v3644_v62, %v3643_v61  ;;  %v4157_v5 = vpack.c.bf16 %v3648_v4, %v3647_v3  ;;  %v4193_v61 = vpack.c.bf16 %v2555_v59, %v2553_v58  ;;  %v3054_v62 = vld [vmem:[%s6427_s11 + $0x8] sm:$0xff]  ;;  %v3060_v4 = vld [vmem:[%s6427_s11 + $0x38] sm:$0xff] }
 0x3a5   : > { %4090 = vmatprep.subr.bf16.mxu1 %v4089_v0  ;;  %v3645_v0 = vld [vmem:[%s6423_s7 + $0x100] sm:$0xff]  ;;  %v3058_v3 = vld [vmem:[%s6427_s11 + $0x28] sm:$0xff] }
 0x3a6   : > { %v4154_v2 = vpack.c.bf16 %v3646_v1, %v3645_v0  ;;  %v3053_v0 = vld [vmem:[%s6427_s11] sm:$0xff] }
 0x3a7   : > { %3604 = vmatmul.mubr.msk.f32.gmra.mrb[22].mxu1 %vm1592_vm7, %v1942_v11  ;;  %v3652_v11 = vld [vmem:[%s6423_s7 + $0x138] sm:$0xff] }
 0x3a8   : > { %4092 = vmatpush1.bf16.msra.mxu1 %v4091_v6  ;;  %2160 = vmatprep.mubr.f32.mxu1 %v4523_v7  ;;  %v3649_v6 = vld [vmem:[%s6423_s7 + $0x120] sm:$0xff]  ;;  %v4163_v12 = vpack.c.bf16 %v3652_v11, %v3651_v10  ;;  %v3062_v10 = vld [vmem:[%s6427_s11 + $0x48] sm:$0xff]  ;;  %v3064_v11 = vld [vmem:[%s6427_s11 + $0x58] sm:$0xff] }
 0x3a9   : > { %4094 = vmatprep.subr.bf16.mxu1 %v4093_v8  ;;  %v3650_v8 = vld [vmem:[%s6423_s7 + $0x128] sm:$0xff] }
 0x3aa   : > { %v4160_v9 = vpack.c.bf16 %v3650_v8, %v3649_v6  ;;  %v4277_v6 = vpack.c.bf16 %v3060_v4, %v3058_v3  ;;  %v3057_v8 = vld [vmem:[%s6427_s11 + $0x20] sm:$0xff] }
 0x3ac   : > { %4096 = vmatpush1.bf16.msra.mxu1 %v4095_v14 }
 0x3ad   : > { %4098 = vmatprep.subr.bf16.mxu1 %v4097_v15 }
 0x3b0   : > { %4100 = vmatpush1.bf16.msra.mxu1 %v4099_v20 }
 0x3b1   : > { %4102 = vmatprep.subr.bf16.mxu1 %v4101_v22 }
 0x3b4   : > { %4104 = vmatpush1.bf16.msra.mxu1 %v4103_v25  ;;  %v3661_v25 = vld [vmem:[%s6425_s9 + $0xa8] sm:$0xff] }
 0x3b5   : > { %3627 = vmatprep.subr.msk.mxu1 %vm1425_vm3, %v3626_v26  ;;  %v3663_v26 = vld [vmem:[%s6425_s9 + $0xb8] sm:$0xff] }
 0x3b8   : > { %3628 = vmatpush1.msk.msra.mxu1 %vm1425_vm3, %v3625_v27  ;;  %v2393_v27 = vld [vmem:[%s6424_s8] sm:$0x1f] }
 0x3b9   : > { %3629 = vmatmul.mubr.msk.f32.vlgmr.msra.gmra.mrb[20].mxu1 %vm1592_vm7, %v2059_v28  ;;  %v4173_v28 = vpack.c.bf16 %v3663_v26, %v3661_v25 }
 0x3ba   : > { %2166 = vmatprep.mubr.f32.mxu1 %v4523_v7 }
 0x3bd   : > { %3630 = vmatmul.mubr.msk.f32.gmra.mrb[22].mxu1 %vm1592_vm7, %v2060_v29  ;;  %v3660_v29 = vld [vmem:[%s6425_s9 + $0xa0] sm:$0xff] }
 0x48c   : > { %v2162_v38 = vpop.f32.mrb[20].mxu1 }
 0x48d   : > { %v2164_v39 = vpop.f32.mrb[21].mxu1  ;;  %v2189_v42 = vadd.f32 %v2182_v35, %v2162_v38  ;;  %v4179_v38 = vpack.c.bf16 %v3666_v37, %v3664_v36  ;;  %v3080_v36 = vld [vmem:[%s6427_s11 + $0xd8] sm:$0xff] }
 0x48e   : > { %v2190_v40 = vadd.f32 %v2186_v34, %v2164_v39  ;;  %v3669_v39 = vld [vmem:[%s6425_s9 + $0xe8] sm:$0xff] }
 0x490   : > { %v2168_v45 = vpop.f32.mrb[22].mxu1  ;;  %3631 = vmatprep.mubr.msk.f32.mxu0 %vm2213_vm8, %v2190_v40 }
 0x491   : > { %v2170_v46 = vpop.f32.mrb[23].mxu1  ;;  %2285 = vmatmul.mubr.f32.vlgmr.msra.gmra.mrb[8].mxu0 %v2189_v42  ;;  %v2191_v50 = vadd.f32 %v2182_v35, %v2168_v45  ;;  %v4177_v35 = vpack.c.bf16 %v3667_v32, %v3665_v31  ;;  %v3673_v45 = vld [vmem:[%s6425_s9 + $0x108] sm:$0xff] }
 0x492   : > { %v2192_v47 = vadd.f32 %v2186_v34, %v2170_v46  ;;  %4137 = vmatpush1.bf16.msra.mxu0 %v4136_v41  ;;  %v4175_v34 = vpack.c.bf16 %v3662_v30, %v3660_v29  ;;  %v3675_v46 = vld [vmem:[%s6425_s9 + $0x118] sm:$0xff]  ;;  %v3074_v29 = vld [vmem:[%s6427_s11 + $0xa8] sm:$0xff] }
 0x493   : > { %4138 = vmatprep.subr.bf16.mxu0 %v4524_v21  ;;  %v3076_v30 = vld [vmem:[%s6427_s11 + $0xb8] sm:$0xff] }
 0x494   : > { %3632 = vmatprep.mubr.msk.f32.mxu0 %vm2213_vm8, %v2192_v47  ;;  %v4293_v32 = vpack.c.bf16 %v3076_v30, %v3074_v29  ;;  %v2558_v29 = vld [vmem:[%s6425_s9 + $0x30] sm:$0xff] }
 0x495   : > { %2290 = vmatmul.mubr.f32.gmra.mrb[10].mxu0 %v2191_v50 }
 0x496   : > { %4140 = vmatpush1.bf16.msra.mxu0 %v4139_v48  ;;  %3653 = vmatprep.mubr.msk.f32.mxu0 %vm2213_vm8, %v2190_v40  ;;  %v3671_v40 = vld [vmem:[%s6425_s9 + $0xf8] sm:$0xff]  ;;  %v3672_v48 = vld [vmem:[%s6425_s9 + $0x100] sm:$0xff] }
 0x497   : > { %4141 = vmatprep.subr.bf16.mxu0 %v4524_v21  ;;  %v4181_v41 = vpack.c.bf16 %v3671_v40, %v3669_v39  ;;  %v3077_v39 = vld [vmem:[%s6427_s11 + $0xc0] sm:$0xff]  ;;  %v3079_v40 = vld [vmem:[%s6427_s11 + $0xd0] sm:$0xff] }
 0x49a   : > { %4143 = vmatpush1.bf16.msra.mxu0 %v4142_v54  ;;  %v3679_v54 = vld [vmem:[%s6425_s9 + $0x138] sm:$0xff] }
 0x49b   : > { %4144 = vmatprep.subr.bf16.mxu0 %v4524_v21  ;;  %v4189_v56 = vpack.c.bf16 %v3679_v54, %v3677_v53  ;;  %v3085_v53 = vld [vmem:[%s6427_s11 + $0x100] sm:$0xff]  ;;  %v3087_v54 = vld [vmem:[%s6427_s11 + $0x110] sm:$0xff] }
 0x49c   : > { %v4307_v59 = vpack.c.bf16 %v3087_v54, %v3085_v53  ;;  %v2568_v54 = vld [vmem:[%s6425_s9 + $0x80] sm:$0xff] }
 0x49e   : > { %4146 = vmatpush1.bf16.msra.mxu0 %v4145_v57  ;;  %v3678_v57 = vld [vmem:[%s6425_s9 + $0x130] sm:$0xff] }
 0x49f   : > { %4147 = vmatprep.subr.bf16.mxu0 %v4524_v21 }
 0x4a2   : > { %4149 = vmatpush1.bf16.msra.mxu0 %v4148_v60  ;;  %v4191_v60 = vpack.c.bf16 %v3678_v57, %v3676_v55  ;;  %v3090_v55 = vld [vmem:[%s6427_s11 + $0x128] sm:$0xff] }
 0x4a3   : > { %4150 = vmatprep.subr.bf16.mxu0 %v4524_v21 }
 0x4a6   : > { %4152 = vmatpush1.bf16.msra.mxu0 %v4151_v63  ;;  %v3056_v63 = vld [vmem:[%s6427_s11 + $0x18] sm:$0xff] }
 0x4a7   : > { %4153 = vmatprep.subr.bf16.mxu0 %v4524_v21  ;;  %v4273_v1 = vpack.c.bf16 %v3056_v63, %v3054_v62  ;;  %v3091_v62 = vld [vmem:[%s6427_s11 + $0x130] sm:$0xff]  ;;  %v3094_v63 = vld [vmem:[%s6427_s11 + $0x148] sm:$0xff] }
 0x4a9   : > { %4274 = vmatprep.subr.bf16.mxu1 %v4273_v1 }
 0x4aa   : > { %4155 = vmatpush1.bf16.msra.mxu0 %v4154_v2  ;;  %v3055_v2 = vld [vmem:[%s6427_s11 + $0x10] sm:$0xff] }
 0x4ab   : > { %4156 = vmatprep.subr.bf16.mxu0 %v4524_v21 }
 0x4ae   : > { %4158 = vmatpush1.bf16.msra.mxu0 %v4157_v5  ;;  %v4275_v5 = vpack.c.bf16 %v3055_v2, %v3053_v0  ;;  %v3096_v0 = vld [vmem:[%s6427_s11 + $0x158] sm:$0xff] }
 0x4af   : > { %4159 = vmatprep.subr.bf16.mxu0 %v4524_v21 }
 0x4b0   : > { %4276 = vmatpush1.bf16.msra.mxu1 %v4275_v5  ;;  %v4313_v5 = vpack.c.bf16 %v3096_v0, %v3094_v63  ;;  %v3689_v63 = vld [vmem:[%s6425_s9 + $0x178] sm:$0xff] }
 0x4b1   : > { %4278 = vmatprep.subr.bf16.mxu1 %v4277_v6  ;;  %v3093_v6 = vld [vmem:[%s6427_s11 + $0x140] sm:$0xff] }
 0x4b2   : > { %4161 = vmatpush1.bf16.msra.mxu0 %v4160_v9  ;;  %v3059_v9 = vld [vmem:[%s6427_s11 + $0x30] sm:$0xff] }
 0x4b3   : > { %4162 = vmatprep.subr.bf16.mxu0 %v4524_v21 }
 0x4b6   : > { %4164 = vmatpush1.bf16.msra.mxu0 %v4163_v12  ;;  %v4279_v12 = vpack.c.bf16 %v3059_v9, %v3057_v8  ;;  %v3095_v8 = vld [vmem:[%s6427_s11 + $0x150] sm:$0xff] }
 0x4b7   : > { %4165 = vmatprep.subr.bf16.mxu0 %v4524_v21 }
 0x4b8   : > { %4280 = vmatpush1.bf16.msra.mxu1 %v4279_v12  ;;  %v4315_v12 = vpack.c.bf16 %v3095_v8, %v3093_v6  ;;  %v3693_v6 = vld [vmem:[%s6425_s9 + $0x198] sm:$0xff] }
 0x4b9   : > { %2381 = vmatmul.mubr.f32.vlgmr.msra.gmra.mrb[12].mxu0 %v2189_v42  ;;  %v3668_v42 = vld [vmem:[%s6425_s9 + $0xe0] sm:$0xff] }
 0x4ba   : > { %3654 = vmatprep.mubr.msk.f32.mxu0 %vm2213_vm8, %v2192_v47  ;;  %v4183_v44 = vpack.c.bf16 %v3670_v43, %v3668_v42  ;;  %v4185_v47 = vpack.c.bf16 %v3675_v46, %v3673_v45  ;;  %v3084_v42 = vld [vmem:[%s6427_s11 + $0xf8] sm:$0xff]  ;;  %v4299_v43 = vpack.c.bf16 %v3079_v40, %v3077_v39  ;;  %v3081_v45 = vld [vmem:[%s6427_s11 + $0xe0] sm:$0xff]  ;;  %v3083_v46 = vld [vmem:[%s6427_s11 + $0xf0] sm:$0xff] }
 0x4bb   : > { %v2560_v40 = vld [vmem:[%s6425_s9 + $0x40] sm:$0xff] }
 0x4bd   : > { %2386 = vmatmul.mubr.f32.gmra.mrb[14].mxu0 %v2191_v50  ;;  %v3674_v50 = vld [vmem:[%s6425_s9 + $0x110] sm:$0xff] }
 0x4be   : > { %3795 = vmatprep.mubr.msk.f32.mxu0 %vm4526_vm9, %v4523_v7  ;;  %v4187_v52 = vpack.c.bf16 %v3674_v50, %v3672_v48  ;;  %v3088_v48 = vld [vmem:[%s6427_s11 + $0x118] sm:$0xff]  ;;  %v4303_v50 = vpack.c.bf16 %v3083_v46, %v3081_v45  ;;  %v2564_v46 = vld [vmem:[%s6425_s9 + $0x60] sm:$0xff] }
 0x564   : > { %v2286_v13 = vpop.f32.mrb[8].mxu0 }
 0x565   : > { %v2288_v14 = vpop.f32.mrb[9].mxu0 }
 0x566   : > { %v3061_v14 = vld [vmem:[%s6427_s11 + $0x40] sm:$0xff] }
 0x568   : > { %v2291_v15 = vpop.f32.mrb[10].mxu0 }
 0x569   : > { %v2293_v16 = vpop.f32.mrb[11].mxu0 }
 0x56a   : > { %v3066_v16 = vld [vmem:[%s6427_s11 + $0x68] sm:$0xff] }
 0x58c   : > { %v2382_v17 = vpop.f32.mrb[12].mxu0 }
 0x58d   : > { %v2391_v18 = vmax.f32 %v2286_v13, %v2382_v17  ;;  %v2384_v19 = vpop.f32.mrb[13].mxu0  ;;  %v4281_v13 = vpack.c.bf16 %v3064_v11, %v3062_v10  ;;  %v3068_v17 = vld [vmem:[%s6427_s11 + $0x78] sm:$0xff]  ;;  %v3098_v10 = vld [vmem:[%s6427_s11 + $0x168] sm:$0xff] }
 0x58e   : > { %v4285_v19 = vpack.c.bf16 %v3068_v17, %v3066_v16  ;;  %v3100_v11 = vld [vmem:[%s6427_s11 + $0x178] sm:$0xff]  ;;  %v2552_v16 = vld [vmem:[%s6425_s9] sm:$0xff]  ;;  %v2554_v17 = vld [vmem:[%s6425_s9 + $0x10] sm:$0xff] }
 0x58f   : > { %4282 = vmatprep.subr.bf16.mxu1 %v4281_v13  ;;  %v4317_v13 = vpack.c.bf16 %v3100_v11, %v3098_v10  ;;  %v3690_v10 = vld [vmem:[%s6425_s9 + $0x180] sm:$0xff]  ;;  %v3692_v11 = vld [vmem:[%s6425_s9 + $0x190] sm:$0xff] }
 0x590   : > { %v2387_v20 = vpop.f32.mrb[14].mxu0 }
 0x591   : > { %v2392_v22 = vmax.f32 %v2291_v15, %v2387_v20  ;;  %v2389_v23 = vpop.f32.mrb[15].mxu0  ;;  %v3063_v15 = vld [vmem:[%s6427_s11 + $0x50] sm:$0xff]  ;;  %v3065_v20 = vld [vmem:[%s6427_s11 + $0x60] sm:$0xff] }
 0x592   : > { %v3070_v23 = vld [vmem:[%s6427_s11 + $0x88] sm:$0xff] }
 0x593   : > { %v4166_v24 = vpack.c.bf16 %v2392_v22, %v2391_v18  ;;  %v4283_v18 = vpack.c.bf16 %v3063_v15, %v3061_v14  ;;  %v3067_v22 = vld [vmem:[%s6427_s11 + $0x70] sm:$0xff]  ;;  %v3097_v14 = vld [vmem:[%s6427_s11 + $0x160] sm:$0xff] }
 0x594   : > { %v4287_v25 = vpack.c.bf16 %v3067_v22, %v3065_v20  ;;  %v3099_v15 = vld [vmem:[%s6427_s11 + $0x170] sm:$0xff]  ;;  %v3102_v20 = vld [vmem:[%s6427_s11 + $0x188] sm:$0xff]  ;;  %v3104_v22 = vld [vmem:[%s6427_s11 + $0x198] sm:$0xff] }
 0x595   : > { %4168 = vmatpush3.bf16.msk.msra.mxu0 %vm4167_vm11, %v4166_v24  ;;  %4284 = vmatpush1.bf16.msra.mxu1 %v4283_v18  ;;  %v2557_v18 = vld [vmem:[%s6425_s9 + $0x28] sm:$0xff]  ;;  %v4321_v30 = vpack.c.bf16 %v3104_v22, %v3102_v20 }
 0x596   : > { %4169 = vmatprep.subr.bf16.mxu0 %v4524_v21  ;;  %4286 = vmatprep.subr.bf16.mxu1 %v4285_v19  ;;  %v2559_v19 = vld [vmem:[%s6425_s9 + $0x38] sm:$0xff] }
 0x598   : > { %3796 = vmatmul.mubr.msk.f32.vlgmr.msra.gmra.mrb[16].mxu0 %vm2394_vm12, %v2393_v27  ;;  %v3069_v27 = vld [vmem:[%s6427_s11 + $0x80] sm:$0xff] }
 0x599   : > { %4172 = vmatpush3.bf16.msk.msra.mxu0 %vm4167_vm11, %v4166_v24  ;;  %3802 = vmatprep.mubr.msk.f32.mxu0 %vm4526_vm9, %v4523_v7  ;;  %v3072_v24 = vld [vmem:[%s6427_s11 + $0x98] sm:$0xff] }
 0x59a   : > { %4174 = vmatprep.subr.bf16.mxu0 %v4173_v28  ;;  %v4289_v26 = vpack.c.bf16 %v3072_v24, %v3070_v23  ;;  %v3071_v28 = vld [vmem:[%s6427_s11 + $0x90] sm:$0xff]  ;;  %4288 = vmatpush1.bf16.msra.mxu1 %v4287_v25  ;;  %v4319_v23 = vpack.c.bf16 %v3099_v15, %v3097_v14  ;;  %v4195_v24 = vpack.c.bf16 %v2554_v17, %v2552_v16  ;;  %v2556_v25 = vld [vmem:[%s6425_s9 + $0x20] sm:$0xff] }
 0x59b   : > { %v4291_v31 = vpack.c.bf16 %v3071_v28, %v3069_v27  ;;  %v3103_v27 = vld [vmem:[%s6427_s11 + $0x190] sm:$0xff]  ;;  %v4197_v28 = vpack.c.bf16 %v2559_v19, %v2557_v18  ;;  %v4223_v14 = vpack.c.bf16 %v3692_v11, %v3690_v10  ;;  %v3694_v16 = vld [vmem:[%s6425_s9 + $0x1a0] sm:$0xff]  ;;  %v3699_v18 = vld [vmem:[%s6425_s9 + $0x1c8] sm:$0xff] }
 0x59c   : > { %3803 = vmatmul.mubr.msk.f32.vlgmr.msra.gmra.mrb[18].mxu0 %vm2394_vm12, %v3657_v33  ;;  %4290 = vmatprep.subr.bf16.mxu1 %v4289_v26  ;;  %v3073_v33 = vld [vmem:[%s6427_s11 + $0xa0] sm:$0xff]  ;;  %v3696_v17 = vld [vmem:[%s6425_s9 + $0x1b0] sm:$0xff]  ;;  %v3701_v19 = vld [vmem:[%s6425_s9 + $0x1d8] sm:$0xff] }
 0x59d   : > { %4176 = vmatpush1.bf16.msra.mxu0 %v4175_v34  ;;  %2662 = vmatprep.mubr.f32.mxu0 %v4523_v7  ;;  %v3075_v34 = vld [vmem:[%s6427_s11 + $0xb0] sm:$0xff]  ;;  %v3101_v26 = vld [vmem:[%s6427_s11 + $0x180] sm:$0xff]  ;;  %v4227_v20 = vpack.c.bf16 %v3696_v17, %v3694_v16  ;;  %v4229_v22 = vpack.c.bf16 %v3701_v19, %v3699_v18  ;;  %v3741_v19 = vld [vmem:[%s6425_s9 + $0x308] sm:$0xff] }
 0x59e   : > { %4178 = vmatprep.subr.bf16.mxu0 %v4177_v35  ;;  %v3078_v35 = vld [vmem:[%s6427_s11 + $0xc8] sm:$0xff]  ;;  %4292 = vmatpush1.bf16.msra.mxu1 %v4291_v31  ;;  %v4295_v37 = vpack.c.bf16 %v3075_v34, %v3073_v33  ;;  %v3736_v17 = vld [vmem:[%s6425_s9 + $0x2e0] sm:$0xff]  ;;  %v3738_v18 = vld [vmem:[%s6425_s9 + $0x2f0] sm:$0xff] }
 0x59f   : > { %4294 = vmatprep.subr.bf16.mxu1 %v4293_v32  ;;  %v3106_v31 = vld [vmem:[%s6427_s11 + $0x1a8] sm:$0xff]  ;;  %v3108_v32 = vld [vmem:[%s6427_s11 + $0x1b8] sm:$0xff] }
 0x5a0   : > { %v2561_v34 = vld [vmem:[%s6425_s9 + $0x48] sm:$0xff] }
 0x5a1   : > { %4180 = vmatpush1.bf16.msra.mxu0 %v4179_v38  ;;  %v4297_v38 = vpack.c.bf16 %v3080_v36, %v3078_v35  ;;  %v2563_v35 = vld [vmem:[%s6425_s9 + $0x58] sm:$0xff]  ;;  %v4323_v36 = vpack.c.bf16 %v3103_v27, %v3101_v26 }
 0x5a2   : > { %4182 = vmatprep.subr.bf16.mxu0 %v4181_v41  ;;  %v3082_v41 = vld [vmem:[%s6427_s11 + $0xe8] sm:$0xff]  ;;  %4296 = vmatpush1.bf16.msra.mxu1 %v4295_v37  ;;  %v4199_v37 = vpack.c.bf16 %v2558_v29, %v2556_v25  ;;  %v4201_v39 = vpack.c.bf16 %v2563_v35, %v2561_v34  ;;  %v3706_v26 = vld [vmem:[%s6425_s9 + $0x1f8] sm:$0xff]  ;;  %v3703_v29 = vld [vmem:[%s6425_s9 + $0x1e0] sm:$0xff] }
 0x5a3   : > { %4298 = vmatprep.subr.bf16.mxu1 %v4297_v38  ;;  %v4325_v38 = vpack.c.bf16 %v3108_v32, %v3106_v31  ;;  %v3704_v25 = vld [vmem:[%s6425_s9 + $0x1e8] sm:$0xff]  ;;  %v3710_v32 = vld [vmem:[%s6425_s9 + $0x218] sm:$0xff]  ;;  %v3707_v35 = vld [vmem:[%s6425_s9 + $0x200] sm:$0xff] }
 0x5a4   : > { %v3708_v31 = vld [vmem:[%s6425_s9 + $0x208] sm:$0xff] }
 0x5a5   : > { %4184 = vmatpush1.bf16.msra.mxu0 %v4183_v44  ;;  %v4301_v44 = vpack.c.bf16 %v3084_v42, %v3082_v41  ;;  %v2562_v41 = vld [vmem:[%s6425_s9 + $0x50] sm:$0xff]  ;;  %v2565_v42 = vld [vmem:[%s6425_s9 + $0x68] sm:$0xff]  ;;  %v4237_v34 = vpack.c.bf16 %v3710_v32, %v3708_v31  ;;  %v3112_v32 = vld [vmem:[%s6427_s11 + $0x1d8] sm:$0xff] }
 0x5a6   : > { %4186 = vmatprep.subr.bf16.mxu0 %v4185_v47  ;;  %v3086_v47 = vld [vmem:[%s6427_s11 + $0x108] sm:$0xff]  ;;  %4300 = vmatpush1.bf16.msra.mxu1 %v4299_v43  ;;  %v2567_v43 = vld [vmem:[%s6425_s9 + $0x78] sm:$0xff] }
 0x5a7   : > { %4302 = vmatprep.subr.bf16.mxu1 %v4301_v44  ;;  %v4203_v44 = vpack.c.bf16 %v2562_v41, %v2560_v40  ;;  %v4205_v45 = vpack.c.bf16 %v2567_v43, %v2565_v42  ;;  %v3711_v42 = vld [vmem:[%s6425_s9 + $0x220] sm:$0xff]  ;;  %v3713_v43 = vld [vmem:[%s6425_s9 + $0x230] sm:$0xff]  ;;  %v3110_v31 = vld [vmem:[%s6427_s11 + $0x1c8] sm:$0xff] }
 0x5a9   : > { %4188 = vmatpush1.bf16.msra.mxu0 %v4187_v52  ;;  %v4305_v52 = vpack.c.bf16 %v3088_v48, %v3086_v47  ;;  %v2566_v47 = vld [vmem:[%s6425_s9 + $0x70] sm:$0xff]  ;;  %v2569_v48 = vld [vmem:[%s6425_s9 + $0x88] sm:$0xff] }
 0x5aa   : > { %4190 = vmatprep.subr.bf16.mxu0 %v4189_v56  ;;  %v3092_v56 = vld [vmem:[%s6427_s11 + $0x138] sm:$0xff]  ;;  %4304 = vmatpush1.bf16.msra.mxu1 %v4303_v50 }
 0x5ab   : > { %4306 = vmatprep.subr.bf16.mxu1 %v4305_v52  ;;  %v2571_v50 = vld [vmem:[%s6425_s9 + $0x98] sm:$0xff]  ;;  %v4207_v52 = vpack.c.bf16 %v2566_v47, %v2564_v46  ;;  %v4243_v46 = vpack.c.bf16 %v3713_v43, %v3711_v42  ;;  %v3202_v43 = vld [vmem:[%s6429_s13] sm:$0xff] }
 0x5ac   : > { %v4209_v53 = vpack.c.bf16 %v2571_v50, %v2569_v48  ;;  %v3715_v48 = vld [vmem:[%s6425_s9 + $0x240] sm:$0xff]  ;;  %v3717_v50 = vld [vmem:[%s6425_s9 + $0x250] sm:$0xff] }
 0x5ad   : > { %4192 = vmatpush1.bf16.msra.mxu0 %v4191_v60  ;;  %v4309_v60 = vpack.c.bf16 %v3092_v56, %v3090_v55  ;;  %v2570_v55 = vld [vmem:[%s6425_s9 + $0x90] sm:$0xff]  ;;  %v3683_v56 = vld [vmem:[%s6425_s9 + $0x148] sm:$0xff] }
 0x5ae   : > { %4194 = vmatprep.subr.bf16.mxu0 %v4193_v61  ;;  %v3089_v61 = vld [vmem:[%s6427_s11 + $0x120] sm:$0xff]  ;;  %4308 = vmatpush1.bf16.msra.mxu1 %v4307_v59 }
 0x5af   : > { %v4311_v4 = vpack.c.bf16 %v3091_v62, %v3089_v61  ;;  %4310 = vmatprep.subr.bf16.mxu1 %v4309_v60  ;;  %v3682_v60 = vld [vmem:[%s6425_s9 + $0x140] sm:$0xff]  ;;  %v3684_v61 = vld [vmem:[%s6425_s9 + $0x150] sm:$0xff]  ;;  %v3687_v62 = vld [vmem:[%s6425_s9 + $0x168] sm:$0xff] }
 0x5b0   : > { %v4215_v0 = vpack.c.bf16 %v3684_v61, %v3682_v60 }
 0x5b2   : > { %4312 = vmatpush1.bf16.msra.mxu1 %v4311_v4 }
 0x5b3   : > { %4314 = vmatprep.subr.bf16.mxu1 %v4313_v5  ;;  %v3691_v5 = vld [vmem:[%s6425_s9 + $0x188] sm:$0xff] }
 0x5b6   : > { %4316 = vmatpush1.bf16.msra.mxu1 %v4315_v12  ;;  %v3695_v12 = vld [vmem:[%s6425_s9 + $0x1a8] sm:$0xff] }
 0x5b7   : > { %4318 = vmatprep.subr.bf16.mxu1 %v4317_v13  ;;  %v3697_v13 = vld [vmem:[%s6425_s9 + $0x1b8] sm:$0xff] }
 0x5b8   : > { %v4225_v15 = vpack.c.bf16 %v3697_v13, %v3695_v12  ;;  %v3732_v12 = vld [vmem:[%s6425_s9 + $0x2c0] sm:$0xff]  ;;  %v3734_v13 = vld [vmem:[%s6425_s9 + $0x2d0] sm:$0xff] }
 0x5ba   : > { %4320 = vmatpush1.bf16.msra.mxu1 %v4319_v23  ;;  %v3698_v23 = vld [vmem:[%s6425_s9 + $0x1c0] sm:$0xff] }
 0x5bb   : > { %4322 = vmatprep.subr.bf16.mxu1 %v4321_v30  ;;  %v3705_v30 = vld [vmem:[%s6425_s9 + $0x1f0] sm:$0xff] }
 0x5be   : > { %4324 = vmatpush1.bf16.msra.mxu1 %v4323_v36  ;;  %v3709_v36 = vld [vmem:[%s6425_s9 + $0x210] sm:$0xff] }
 0x5bf   : > { %4326 = vmatprep.subr.bf16.mxu1 %v4325_v38  ;;  %v3712_v38 = vld [vmem:[%s6425_s9 + $0x228] sm:$0xff]  ;;  %v4239_v40 = vpack.c.bf16 %v3709_v36, %v3707_v35  ;;  %v3111_v35 = vld [vmem:[%s6427_s11 + $0x1d0] sm:$0xff] }
 0x66b   : > { %v2468_v57 = vpop.f32.mrb[16].mxu0 }
 0x66c   : > { %v3797_v58 = vpop.f32.mrb[17].mxu0 }
 0x66d   : > { %v4211_v58 = vpack.c.bf16 %v2570_v55, %v2568_v54  ;;  %v4247_v54 = vpack.c.bf16 %v3717_v50, %v3715_v48  ;;  %v3204_v50 = vld [vmem:[%s6429_s13 + $0x10] sm:$0xff] }
 0x66f   : > { %v2543_v1 = vpop.f32.mrb[18].mxu0 }
 0x670   : > { %v2547_v2 = vmax.f32 %v2468_v57, %v2543_v1  ;;  %v3804_v3 = vpop.f32.mrb[19].mxu0  ;;  %v3685_v57 = vld [vmem:[%s6425_s9 + $0x158] sm:$0xff]  ;;  %v4217_v1 = vpack.c.bf16 %v3689_v63, %v3687_v62  ;;  %v3724_v62 = vld [vmem:[%s6425_s9 + $0x280] sm:$0xff]  ;;  %v3726_v63 = vld [vmem:[%s6425_s9 + $0x290] sm:$0xff] }
 0x671   : > { %v4213_v59 = vpack.c.bf16 %v3685_v57, %v3683_v56  ;;  %v3688_v3 = vld [vmem:[%s6425_s9 + $0x170] sm:$0xff]  ;;  %v3719_v56 = vld [vmem:[%s6425_s9 + $0x260] sm:$0xff] }
 0x672   : > { %v2548_v9 = vmax.f32 %v2547_v2, 0.0  ;;  %v3686_v2 = vld [vmem:[%s6425_s9 + $0x160] sm:$0xff]  ;;  %v3721_v57 = vld [vmem:[%s6425_s9 + $0x270] sm:$0xff] }
 0x673   : > { %v4219_v8 = vpack.c.bf16 %v3688_v3, %v3686_v2  ;;  %v4251_v60 = vpack.c.bf16 %v3721_v57, %v3719_v56  ;;  %v4255_v2 = vpack.c.bf16 %v3726_v63, %v3724_v62  ;;  %v3208_v57 = vld [vmem:[%s6429_s13 + $0x30] sm:$0xff] }
 0x674   : > { %2550 = vst.msk [vmem:[#allocation3] sm:$0x1f] %vm2549_vm13, %v2548_v9  ;;  %v4221_v9 = vpack.c.bf16 %v3693_v6, %v3691_v5  ;;  %v3730_v5 = vld [vmem:[%s6425_s9 + $0x2b0] sm:$0xff] }
 0x675   : > { %v3212_v63 = vld [vmem:[%s6429_s13 + $0x50] sm:$0xff] }
 0x67b   : > { %v2572_v33 = vld [vmem:[#allocation3 + $0x1] sm:$0x1]  ;;  %v2551_v4 = vld [vmem:[#allocation3] sm:$0x1]  ;;  %v2841_v6 = vld [vmem:[#allocation3 + $0x3] sm:$0x1] }
 0x67c   : > { %3680 = vmatmul.mubr.msk.f32.vlgmr.msra.gmra.mrb[20].mxu0 %vm2594_vm14, %v2572_v33  ;;  %v4235_v33 = vpack.c.bf16 %v3705_v30, %v3703_v29  ;;  %v3107_v29 = vld [vmem:[%s6427_s11 + $0x1b0] sm:$0xff] }
 0x67d   : > { %4196 = vmatpush1.bf16.msra.mxu0 %v4195_v24  ;;  %2736 = vmatprep.mubr.f32.mxu0 %v4523_v7  ;;  %v3700_v24 = vld [vmem:[%s6425_s9 + $0x1d0] sm:$0xff] }
 0x67e   : > { %4198 = vmatprep.subr.bf16.mxu0 %v4197_v28  ;;  %v4231_v27 = vpack.c.bf16 %v3700_v24, %v3698_v23  ;;  %v4233_v28 = vpack.c.bf16 %v3706_v26, %v3704_v25  ;;  %v3740_v24 = vld [vmem:[%s6425_s9 + $0x300] sm:$0xff]  ;;  %v3742_v25 = vld [vmem:[%s6425_s9 + $0x310] sm:$0xff] }
 0x67f   : > { %v4271_v26 = vpack.c.bf16 %v3742_v25, %v3740_v24 }
 0x681   : > { %4200 = vmatpush1.bf16.msra.mxu0 %v4199_v37  ;;  %v2743_v37 = vld [vmem:[#allocation3 + $0x2] sm:$0x1] }
 0x682   : > { %4202 = vmatprep.subr.bf16.mxu0 %v4201_v39  ;;  %v3714_v39 = vld [vmem:[%s6425_s9 + $0x238] sm:$0xff] }
 0x683   : > { %v4241_v41 = vpack.c.bf16 %v3714_v39, %v3712_v38 }
 0x685   : > { %4204 = vmatpush1.bf16.msra.mxu0 %v4203_v44  ;;  %v3716_v44 = vld [vmem:[%s6425_s9 + $0x248] sm:$0xff] }
 0x686   : > { %4206 = vmatprep.subr.bf16.mxu0 %v4205_v45  ;;  %v3718_v45 = vld [vmem:[%s6425_s9 + $0x258] sm:$0xff] }
 0x687   : > { %v4245_v47 = vpack.c.bf16 %v3718_v45, %v3716_v44  ;;  %v3203_v44 = vld [vmem:[%s6429_s13 + $0x8] sm:$0xff] }
 0x689   : > { %4208 = vmatpush1.bf16.msra.mxu0 %v4207_v52  ;;  %v3720_v52 = vld [vmem:[%s6425_s9 + $0x268] sm:$0xff] }
 0x68a   : > { %4210 = vmatprep.subr.bf16.mxu0 %v4209_v53  ;;  %v3722_v53 = vld [vmem:[%s6425_s9 + $0x278] sm:$0xff] }
 0x68b   : > { %v4249_v55 = vpack.c.bf16 %v3722_v53, %v3720_v52  ;;  %v3205_v52 = vld [vmem:[%s6429_s13 + $0x18] sm:$0xff] }
 0x68c   : > { %v4337_v53 = vpack.c.bf16 %v3205_v52, %v3204_v50 }
 0x68d   : > { %4212 = vmatpush1.bf16.msra.mxu0 %v4211_v58  ;;  %v3725_v58 = vld [vmem:[%s6425_s9 + $0x288] sm:$0xff] }
 0x68e   : > { %4214 = vmatprep.subr.bf16.mxu0 %v4213_v59  ;;  %v3727_v59 = vld [vmem:[%s6425_s9 + $0x298] sm:$0xff] }
 0x68f   : > { %v4253_v61 = vpack.c.bf16 %v3727_v59, %v3725_v58  ;;  %v3209_v58 = vld [vmem:[%s6429_s13 + $0x38] sm:$0xff] }
 0x690   : > { %3681 = vmatmul.mubr.msk.f32.vlgmr.msra.gmra.mrb[20].mxu0 %vm2594_vm14, %v2551_v4  ;;  %v3728_v4 = vld [vmem:[%s6425_s9 + $0x2a0] sm:$0xff]  ;;  %v4343_v59 = vpack.c.bf16 %v3209_v58, %v3208_v57 }
 0x691   : > { %4216 = vmatpush1.bf16.msra.mxu0 %v4215_v0  ;;  %2832 = vmatprep.mubr.f32.mxu0 %v4523_v7  ;;  %v3729_v0 = vld [vmem:[%s6425_s9 + $0x2a8] sm:$0xff]  ;;  %v4259_v10 = vpack.c.bf16 %v3730_v5, %v3728_v4  ;;  %v3216_v5 = vld [vmem:[%s6429_s13 + $0x70] sm:$0xff] }
 0x692   : > { %4218 = vmatprep.subr.bf16.mxu0 %v4217_v1  ;;  %v3731_v1 = vld [vmem:[%s6425_s9 + $0x2b8] sm:$0xff] }
 0x693   : > { %v4257_v3 = vpack.c.bf16 %v3731_v1, %v3729_v0  ;;  %v3213_v0 = vld [vmem:[%s6429_s13 + $0x58] sm:$0xff] }
 0x694   : > { %v4349_v1 = vpack.c.bf16 %v3213_v0, %v3212_v63 }
 0x695   : > { %4220 = vmatpush1.bf16.msra.mxu0 %v4219_v8  ;;  %v3733_v8 = vld [vmem:[%s6425_s9 + $0x2c8] sm:$0xff] }
 0x696   : > { %4222 = vmatprep.subr.bf16.mxu0 %v4221_v9  ;;  %v3735_v9 = vld [vmem:[%s6425_s9 + $0x2d8] sm:$0xff] }
 0x697   : > { %v4261_v11 = vpack.c.bf16 %v3735_v9, %v3733_v8  ;;  %v3218_v9 = vld [vmem:[%s6429_s13 + $0x80] sm:$0xff] }
 0x699   : > { %4224 = vmatpush1.bf16.msra.mxu0 %v4223_v14  ;;  %v3737_v14 = vld [vmem:[%s6425_s9 + $0x2e8] sm:$0xff] }
 0x69a   : > { %4226 = vmatprep.subr.bf16.mxu0 %v4225_v15  ;;  %v3739_v15 = vld [vmem:[%s6425_s9 + $0x2f8] sm:$0xff] }
 0x69b   : > { %v4265_v16 = vpack.c.bf16 %v3739_v15, %v3737_v14 }
 0x69d   : > { %4228 = vmatpush1.bf16.msra.mxu0 %v4227_v20  ;;  %v3743_v20 = vld [vmem:[%s6425_s9 + $0x318] sm:$0xff] }
 0x69e   : > { %4230 = vmatprep.subr.bf16.mxu0 %v4229_v22  ;;  %v4267_v22 = vpack.c.bf16 %v3738_v18, %v3736_v17  ;;  %v4269_v23 = vpack.c.bf16 %v3743_v20, %v3741_v19  ;;  %v3220_v19 = vld [vmem:[%s6430_s14] sm:$0x1] }
 0x6a1   : > { %4232 = vmatpush1.bf16.msra.mxu0 %v4231_v27  ;;  %v2939_v27 = vld [vmem:[#allocation3 + $0x4] sm:$0x1] }
 0x6a2   : > { %4234 = vmatprep.subr.bf16.mxu0 %v4233_v28  ;;  %v3105_v28 = vld [vmem:[%s6427_s11 + $0x1a0] sm:$0xff] }
 0x6a3   : > { %v4327_v30 = vpack.c.bf16 %v3107_v29, %v3105_v28 }
 0x6a4   : > { %3702 = vmatmul.mubr.msk.f32.vlgmr.msra.gmra.mrb[20].mxu0 %vm2594_vm14, %v2743_v37  ;;  %v3037_v37 = vld [vmem:[%s6426_s10] sm:$0x3] }
 0x6a5   : > { %4236 = vmatpush1.bf16.msra.mxu0 %v4235_v33  ;;  %2930 = vmatprep.mubr.f32.mxu0 %v4523_v7  ;;  %v4329_v33 = vpack.c.bf16 %v3112_v32, %v3110_v31  ;;  %v3042_v38 = vrot.slane %v3037_v37, %v5164_v51  ;;  %v3046_v39 = vrot.slane %v3037_v37, %v5159_v49 }
 0x6a6   : > { %4238 = vmatprep.subr.bf16.mxu0 %v4237_v34  ;;  %4328 = vmatpush1.bf16.msra.mxu1 %v4327_v30  ;;  %v3109_v34 = vld [vmem:[%s6427_s11 + $0x1c0] sm:$0xff] }
 0x6a7   : > { %v4331_v36 = vpack.c.bf16 %v3111_v35, %v3109_v34  ;;  %4330 = vmatprep.subr.bf16.mxu1 %v4329_v33 }
 0x6a9   : > { %4240 = vmatpush1.bf16.msra.mxu0 %v4239_v40 }
 0x6aa   : > { %4242 = vmatprep.subr.bf16.mxu0 %v4241_v41  ;;  %4332 = vmatpush1.bf16.msra.mxu1 %v4331_v36 }
 0x6ab   : > { %4333 = vmatprep.subr.bf16.mxu1 %v4524_v21 }
 0x6ad   : > { %4244 = vmatpush1.bf16.msra.mxu0 %v4243_v46 }
 0x6ae   : > { %4246 = vmatprep.subr.bf16.mxu0 %v4245_v47  ;;  %v4334_v47 = vpack.c.bf16 %v3203_v44, %v3202_v43 }
 0x6b1   : > { %4248 = vmatpush1.bf16.msra.mxu0 %v4247_v54  ;;  %v3206_v54 = vld [vmem:[%s6429_s13 + $0x20] sm:$0xff] }
 0x6b2   : > { %4250 = vmatprep.subr.bf16.mxu0 %v4249_v55  ;;  %v3207_v55 = vld [vmem:[%s6429_s13 + $0x28] sm:$0xff] }
 0x6b3   : > { %v4340_v56 = vpack.c.bf16 %v3207_v55, %v3206_v54 }
 0x6b5   : > { %4252 = vmatpush1.bf16.msra.mxu0 %v4251_v60  ;;  %v3210_v60 = vld [vmem:[%s6429_s13 + $0x40] sm:$0xff] }
 0x6b6   : > { %4254 = vmatprep.subr.bf16.mxu0 %v4253_v61  ;;  %v3211_v61 = vld [vmem:[%s6429_s13 + $0x48] sm:$0xff] }
 0x6b7   : > { %v4346_v62 = vpack.c.bf16 %v3211_v61, %v3210_v60 }
 0x6b8   : > { %3723 = vmatmul.mubr.msk.f32.vlgmr.msra.gmra.mrb[20].mxu0 %vm2594_vm14, %v2841_v6  ;;  %v3217_v6 = vld [vmem:[%s6429_s13 + $0x78] sm:$0xff] }
 0x6b9   : > { %4256 = vmatpush1.bf16.msra.mxu0 %v4255_v2  ;;  %3028 = vmatprep.mubr.f32.mxu0 %v4523_v7  ;;  %v4263_v7 = vpack.c.bf16 %v3734_v13, %v3732_v12  ;;  %v3214_v2 = vld [vmem:[%s6429_s13 + $0x60] sm:$0xff]  ;;  %v4355_v8 = vpack.c.bf16 %v3217_v6, %v3216_v5 }
 0x6ba   : > { %4258 = vmatprep.subr.bf16.mxu0 %v4257_v3  ;;  %v3215_v3 = vld [vmem:[%s6429_s13 + $0x68] sm:$0xff]  ;;  %v3113_v12 = vld [vmem:[%s6428_s12] sm:$0x3] }
 0x6bb   : > { %v4352_v4 = vpack.c.bf16 %v3215_v3, %v3214_v2  ;;  %v3118_v13 = vrot.slane %v3113_v12, %v5164_v51 }
 0x6bd   : > { %4260 = vmatpush1.bf16.msra.mxu0 %v4259_v10  ;;  %v3219_v10 = vld [vmem:[%s6429_s13 + $0x88] sm:$0xff] }
 0x6be   : > { %4262 = vmatprep.subr.bf16.mxu0 %v4261_v11  ;;  %v4358_v11 = vpack.c.bf16 %v3219_v10, %v3218_v9 }
 0x6c1   : > { %4264 = vmatpush1.bf16.msra.mxu0 %v4263_v7 }
 0x6c2   : > { %4266 = vmatprep.subr.bf16.mxu0 %v4265_v16 }
 0x6c5   : > { %4268 = vmatpush1.bf16.msra.mxu0 %v4267_v22 }
 0x6c6   : > { %4270 = vmatprep.subr.bf16.mxu0 %v4269_v23 }
 0x6c9   : > { %4272 = vmatpush1.bf16.msra.mxu0 %v4271_v26 }
 0x6cc   : > { %3744 = vmatmul.mubr.msk.f32.vlgmr.msra.gmra.mrb[20].mxu0 %vm2594_vm14, %v2939_v27 }
 0x79f   : > { %v3030_v40 = vpop.f32.mrb[20].mxu0 }
 0x7a0   : > { %v3049_v41 = vadd.f32 %v3042_v38, %v3030_v40  ;;  %v3032_v42 = vpop.f32.mrb[21].mxu0 }
 0x7a1   : > { %v3050_v45 = vadd.f32 %v3046_v39, %v3032_v42 }
 0x7a2   : > { %v3051_v48 = vmax.f32 %v3049_v41, 0.0 }
 0x7a3   : > { %v3052_v46 = vmax.f32 %v3050_v45, 0.0 }
 0x7a5   : > { %3745 = vmatprep.mubr.msk.f32.mxu1 %vm3125_vm15, %v3052_v46 }
 0x7a6   : > { %3194 = vmatmul.mubr.f32.vlgmr.msra.gmra.mrb[24].mxu1 %v3051_v48 }
 0x7a7   : > { %4335 = vmatpush1.bf16.msra.mxu1 %v4334_v47 }
 0x7a8   : > { %4336 = vmatprep.subr.bf16.mxu1 %v4524_v21 }
 0x7ab   : > { %4338 = vmatpush1.bf16.msra.mxu1 %v4337_v53 }
 0x7ac   : > { %4339 = vmatprep.subr.bf16.mxu1 %v4524_v21 }
 0x7af   : > { %4341 = vmatpush1.bf16.msra.mxu1 %v4340_v56 }
 0x7b0   : > { %4342 = vmatprep.subr.bf16.mxu1 %v4524_v21 }
 0x7b3   : > { %4344 = vmatpush1.bf16.msra.mxu1 %v4343_v59 }
 0x7b4   : > { %4345 = vmatprep.subr.bf16.mxu1 %v4524_v21 }
 0x7b7   : > { %4347 = vmatpush1.bf16.msra.mxu1 %v4346_v62 }
 0x7b8   : > { %4348 = vmatprep.subr.bf16.mxu1 %v4524_v21 }
 0x7bb   : > { %4350 = vmatpush1.bf16.msra.mxu1 %v4349_v1 }
 0x7bc   : > { %4351 = vmatprep.subr.bf16.mxu1 %v4524_v21 }
 0x7bf   : > { %4353 = vmatpush1.bf16.msra.mxu1 %v4352_v4 }
 0x7c0   : > { %4354 = vmatprep.subr.bf16.mxu1 %v4524_v21 }
 0x7c3   : > { %4356 = vmatpush1.bf16.msra.mxu1 %v4355_v8 }
 0x7c4   : > { %4357 = vmatprep.subr.bf16.mxu1 %v4524_v21  ;;  %v3122_v21 = vrot.slane %v3113_v12, %v5159_v49 }
 0x7c7   : > { %4359 = vmatpush1.bf16.msra.mxu1 %v4358_v11 }
 0x879   : > { %v3195_v14 = vpop.f32.mrb[24].mxu1 }
 0x87a   : > { %v3196_v15 = vadd.f32 %v3195_v14, %v3118_v13  ;;  %v3197_v7 = vpop.f32.mrb[25].mxu1 }
 0x87b   : > { %v3198_v16 = vadd.f32 %v3197_v7, %v3122_v21 }
 0x87c   : > { %v3200_v18 = vmax.f32 %v3196_v15, 0.0 }
 0x87d   : > { %v3201_v17 = vmax.f32 %v3198_v16, 0.0 }
 0x87f   : > { %3746 = vmatprep.mubr.msk.f32.mxu1 %vm3221_vm0, %v3201_v17 }
 0x880   : > { %3290 = vmatmul.mubr.f32.vlgmr.msra.gmra.mrb[26].mxu1 %v3200_v18 }
 0x953   : > { %v3291_v51 = vpop.f32.mrb[26].mxu1 }
 0x954   : > { %v3292_v49 = vadd.f32 %v3291_v51, %v3220_v19  ;;  %v3293_v20 = vpop.f32.mrb[27].mxu1 }
 0x956   : > { %3295 = vst [vmem:[%s486_s23] sm:$0x1] %v3292_v49 }
 0x957   : > { %4472 = shalt.err (!%p4469_p3)
}
 0x958   : > { %s4473_s25 = scalar_lea.hbm %s6374_s24, 16  ;;  %s4477_s16 = scalar_lea.hbm %s6431_s15, 32 }
 0x959   : > { %p4474_p4 = scmp.ne.s32.totalorder %s6374_s24, %s4473_s25  ;;  %p4478_p9 = scmp.lt.u32.totalorder %s6374_s24, %s6431_s15 }
 0x95a   : > { %p4479_p10 = scmp.lt.u32.totalorder %s4477_s16, %s4473_s25  ;;  %p4481_p12 = scmp.lt.u32.totalorder %s4473_s25, %s6374_s24 }
 0x95b   : > { %p4475_p7 = pnand %p4474_p4, %p4646_p5 }
 0x95c   : > { %p4480_p11 = por %p4479_p10, %p4478_p9 }
 0x95d   : > { %p4476_p8 = pneg %p4475_p7 }
 0x95e   : > { %p4482_p13 = por %p4481_p12, %p4480_p11 }
 0x960   : > { %p4483_p0 = pnand %p4482_p13, %p4476_p8 }
 0x962   : > { %4486 = shalt.err (!%p4483_p0)
}
 0x963   : > { %4416 = dma.vmem_to_hbm [thread:$0]  (%p4646_p5), %s6376_s20, 16, %s6374_s24, %s3297_s18  }
 0x964 PF: > { %s6448_s21 = sld [smem:[#allocation9_spill]]  ;;  %s6449_s30 = sld [smem:[#allocation7_spill]] }
 0x96a   : > { %p4422_p1 = scmp.ge.s32.totalorder %s6448_s21, 2  ;;  %s3321_s29 = sand.u32 1, %s6449_s30  }
 0x96b   : > { %s3322_s17 = scalar_lea.sflag [#allocation5], %s3321_s29 }
 0x96c   : > { %p4419_p2 = pnand %p4422_p1, %p4650_p6 }
 0x96e   : > { %4504 = dma.done.wait (!%p4419_p2), %s3322_s17, 16  }
 0x96f   : > { %4506 = vsyncadd (!%p4419_p2), %s3322_s17, 4294967280  ;;  %s6451_s21 = sld [smem:[#allocation10_spill]]  ;;  %s6452_s25 = sld [smem:[#allocation8_spill]] }
 0x970   : > { %s6453_s20 = sld [smem:[#allocation11_spill]]  ;;  %s6454_s18 = smov %s4513_s19 }
 0x975   : > { %p25_p3 = scmp.ge.s32.totalorder %s6451_s21, 4   ;;  %s6455_s19 = smov %s6452_s25 }
 0x977   :  { %27 = sbr.rel (!%p25_p3) target bundleno = 5 (0x5), region = 131 }
 0x97e   :  { %3326 = vsyncpa [#allocation5], 1 }
 0x97f   :  { %3328 = vsyncpa [#allocation5 + $0x1], 1 }

</bundles_post_ra>
